<compile_context>
chip_gen: v7x
topology: tpu7x:2x2x1
jax: 0.10.0
libtpu: 0.0.40
codegen_flags: <defaults>
</compile_context>

<pallas_src>
import math
from functools import partial

import jax
import jax.numpy as jnp
from jax.experimental import pallas as pl
from jax.experimental.pallas import tpu as pltpu


def _round_up(x: int, m: int) -> int:
    return ((x + m - 1) // m) * m


def _cross_attention_kernel(proj_ref, keys_ref, out_ref, m_scratch, l_scratch,
                            *, n_valid: int, n_block: int, apply_mask: bool):
    # proj_ref:  (TB, Dp)  f32   pre-projected, pre-scaled query rows (resident per batch tile)
    # keys_ref:  (TB, NB, Dp)    keys tile for the current N block (input dtype)
    # out_ref:   (TB, Np)  f32   attention weights; resident accumulator across the N axis
    # m_scratch, l_scratch: (TB, 1) f32  online-softmax running max / sum
    n = pl.program_id(1)
    n_last = pl.num_programs(1) - 1

    @pl.when(n == 0)
    def _init():
        m_scratch[...] = jnp.full_like(m_scratch, -jnp.inf)
        l_scratch[...] = jnp.zeros_like(l_scratch)
        out_ref[...] = jnp.zeros_like(out_ref)

    proj = proj_ref[...]                                        # (TB, Dp) f32
    keys = keys_ref[...].astype(jnp.float32)                    # (TB, NB, Dp) f32 in vregs

    # energy[b, j] = sum_d proj[b, d] * keys[b, j, d]
    # VPU multiply + fused lane reduce over d (XLU slot) -- avoids the M=1 MXU
    # contraction whose weight-push cycles would bind before HBM.
    energy = jnp.sum(keys * proj[:, None, :], axis=-1)          # (TB, NB) f32

    # Mask padded similar-patient lanes (global index >= n_valid) before softmax.
    if apply_mask:
        lane = jax.lax.broadcasted_iota(jnp.int32, energy.shape, 1) + n * n_block
        energy = jnp.where(lane < n_valid, energy, -jnp.inf)

    # Online softmax (flash-attention style).  The full output row is resident
    # in VMEM, so rescaling previously written blocks is a cheap TB*Np VPU pass.
    m_prev = m_scratch[...]                                     # (TB, 1)
    m_new = jnp.maximum(m_prev, jnp.max(energy, axis=-1, keepdims=True))
    alpha = jnp.exp(m_prev - m_new)                             # (TB, 1); exp(-inf)=0 on step 0
    p = jnp.exp(energy - m_new)                                 # (TB, NB)
    l_scratch[...] = alpha * l_scratch[...] + jnp.sum(p, axis=-1, keepdims=True)
    m_scratch[...] = m_new

    out_ref[...] = out_ref[...] * alpha                         # rescale previous blocks
    start = pl.multiple_of(n * n_block, n_block)                # lane-aligned (n_block % 128 == 0)
    out_ref[:, pl.ds(start, n_block)] = p

    @pl.when(n == n_last)
    def _finalize():
        inv = pl.reciprocal(l_scratch[...], approx=False)       # exact normalization
        out_ref[...] = out_ref[...] * inv


def cross_attention(query, keys, wq, bq, *, block_b: int | None = None,
                    block_n: int | None = None,
                    vmem_budget_bytes: int = 28 * 1024 * 1024):
    """query: (B, D), keys: (B, N, D), wq: (D, D) torch layout, bq: (D,).

    Returns softmax attention weights of shape (B, 1, N), matching the PyTorch
    forward (key_fc is unused in forward, so keys' feature dim must equal D).
    """
    B, D = query.shape
    Bk, N, Dk = keys.shape
    assert Bk == B, "batch mismatch between query and keys"
    assert Dk == D, "keys feature dim must equal patient_rep_dim (key_fc unused in forward)"
    assert N >= 1
    scale = 1.0 / math.sqrt(D)
    out_dtype = jnp.result_type(query, keys)

    # --- Hoisted query projection: plain XLA matmul, 1/sqrt(D) folded into params. ---
    wq_s = (wq * scale).T.astype(jnp.float32)                   # (in, out)
    bq_s = (bq * scale).astype(jnp.float32)
    proj = jnp.dot(query.astype(jnp.float32), wq_s) + bq_s      # (B, D) f32

    # --- Lane/sublane-friendly padded sizes and generation-safe tile choice. ---
    Dp = _round_up(D, 128)
    keys_itemsize = jnp.dtype(keys.dtype).itemsize

    if block_n is None:
        block_n = min(512, _round_up(N, 128))
    block_n = _round_up(block_n, 128)
    Np = _round_up(N, block_n)

    if block_b is None:
        # Target ~4 MiB per keys buffer to amortize the ~0.35 us grid-step cost.
        per_row = block_n * Dp * keys_itemsize
        tb = max(8, min(128, ((4 * 1024 * 1024) // per_row // 8) * 8))
    else:
        tb = _round_up(block_b, 8)
    tb = max(8, min(tb, _round_up(B, 8)))

    def _working_bytes(tb_):
        return (2 * tb_ * block_n * Dp * keys_itemsize          # keys double buffer
                + 2 * tb_ * Dp * 4                              # proj double buffer
                + 2 * tb_ * Np * 4                              # resident output (dbl-buffered)
                + 4 * tb_ * 128 * 4)                            # softmax scratch (padded)

    while tb > 8 and _working_bytes(tb) > vmem_budget_bytes:
        tb -= 8

    Bp = _round_up(B, tb)
    num_b = Bp // tb
    num_n = Np // block_n

    proj_p = jnp.pad(proj, ((0, Bp - B), (0, Dp - D)))
    keys_p = jnp.pad(keys, ((0, Bp - B), (0, Np - N), (0, Dp - D)))

    kernel = partial(_cross_attention_kernel, n_valid=N, n_block=block_n,
                     apply_mask=(Np > N))

    # Explicit VMEM limit (default scoped limit is 16/32 MiB; v7x physical is 64 MiB).
    vmem_limit = int(min(60 * 1024 * 1024,
                         max(32 * 1024 * 1024, 2 * _working_bytes(tb))))

    out = pl.pallas_call(
        kernel,
        out_shape=jax.ShapeDtypeStruct((Bp, Np), jnp.float32),
        grid_spec=pltpu.PrefetchScalarGridSpec(
            num_scalar_prefetch=0,
            grid=(num_b, num_n),
            in_specs=[
                pl.BlockSpec((tb, Dp), lambda i, n: (i, 0)),              # proj (resident per i)
                pl.BlockSpec((tb, block_n, Dp), lambda i, n: (i, n, 0)),  # keys tile (pipelined)
            ],
            out_specs=pl.BlockSpec((tb, Np), lambda i, n: (i, 0)),        # resident across n
            scratch_shapes=[
                pltpu.VMEM((tb, 1), jnp.float32),   # running max
                pltpu.VMEM((tb, 1), jnp.float32),   # running sum
            ],
        ),
        compiler_params=pltpu.CompilerParams(
            dimension_semantics=("parallel", "arbitrary"),
            vmem_limit_bytes=vmem_limit,
        ),
    )(proj_p, keys_p)

    return out[:B, :N][:, None, :].astype(out_dtype)            # (B, 1, N)


def _reference(query, keys, wq, bq):
    """Plain-JAX reference of the PyTorch forward, for verification."""
    D = query.shape[-1]
    proj = query @ wq.T + bq                                    # (B, D)
    energy = jnp.einsum("bd,bnd->bn", proj, keys) / math.sqrt(D)
    return jax.nn.softmax(energy, axis=-1)[:, None, :]


if __name__ == "__main__":
    key = jax.random.PRNGKey(0)

    def _check(B, N, D, subkey, **kw):
        k_q, k_keys, k_wq, k_bq, k_wk, k_bk = jax.random.split(subkey, 6)
        query = jax.random.normal(k_q, (B, D), dtype=jnp.float32)
        keys = jax.random.normal(k_keys, (B, N, D), dtype=jnp.float32)
        bound = 1.0 / math.sqrt(D)
        wq = jax.random.uniform(k_wq, (D, D), minval=-bound, maxval=bound, dtype=jnp.float32)
        bq = jax.random.uniform(k_bq, (D,), minval=-bound, maxval=bound, dtype=jnp.float32)
        # key_fc parameters: created to mirror __init__, unused in forward (as in PyTorch).
        wk = jax.random.uniform(k_wk, (D, D), minval=-bound, maxval=bound, dtype=jnp.float32)  # noqa: F841
        bk = jax.random.uniform(k_bk, (D,), minval=-bound, maxval=bound, dtype=jnp.float32)    # noqa: F841

        out = jax.block_until_ready(cross_attention(query, keys, wq, bq, **kw))
        ref = _reference(query, keys, wq, bq)
        assert out.shape == (B, 1, N)
        assert jnp.allclose(out, ref, atol=1e-5, rtol=1e-5), "mismatch vs reference"
        assert jnp.allclose(jnp.sum(out, axis=-1), 1.0, atol=1e-5), "softmax rows must sum to 1"

    k1, k2 = jax.random.split(key)
    # Primary small config consistent with the module (batch, similar patients, rep dim).
    _check(2, 8, 32, k1)
    # Exercise the multi-tile-N online-softmax path (forced block_n=128 -> 2 N tiles).
    _check(4, 200, 64, k2, block_n=128)

    print("KERNEL_OK")
</pallas_src>

<mosaic_0001>
module attributes {stable_mosaic.version = 11 : i64} {
  func.func @_cross_attention_kernel(%arg0: i32, %arg1: i32, %arg2: memref<8x128xf32, #tpu.memory_space<vmem>>, %arg3: memref<8x128x128xf32, #tpu.memory_space<vmem>>, %arg4: memref<8x128xf32, #tpu.memory_space<vmem>>, %arg5: memref<8x1xf32, #tpu.memory_space<vmem>>, %arg6: memref<8x1xf32, #tpu.memory_space<vmem>>) attributes {dimension_semantics = [#tpu.dimension_semantics<parallel>, #tpu.dimension_semantics<arbitrary>], iteration_bounds = array<i64: 1, 1>, scalar_prefetch = 0 : i64, scratch_operands = 2 : i64, tpu.core_type = #tpu.core_type<tc>, window_params = [{transform_indices = @transform_0, window_bounds = array<i64: 8, 128>}, {transform_indices = @transform_1, window_bounds = array<i64: 8, 128, 128>}, {transform_indices = @transform_2, window_bounds = array<i64: 8, 128>}]} {
    %c0_i32 = arith.constant 0 : i32
    %0 = arith.cmpi eq, %arg1, %c0_i32 : i32
    %1 = arith.extui %0 : i1 to i32
    %c0_i32_0 = arith.constant 0 : i32
    %2 = arith.cmpi ne, %1, %c0_i32_0 : i32
    scf.if %2 {
      %cst_24 = arith.constant 0xFF800000 : f32
      %44 = vector.broadcast %cst_24 : f32 to vector<8x1xf32>
      %c0_25 = arith.constant 0 : index
      %c0_26 = arith.constant 0 : index
      %45 = vector.load %arg5[%c0_25, %c0_26] : memref<8x1xf32, #tpu.memory_space<vmem>>, vector<8x1xf32>
      tpu.vector_store %arg5[%c0_25, %c0_26], %44 {strides = array<i32>} : memref<8x1xf32, #tpu.memory_space<vmem>>, vector<8x1xf32>,
      %cst_27 = arith.constant 0.000000e+00 : f32
      %46 = vector.broadcast %cst_27 : f32 to vector<8x1xf32>
      %c0_28 = arith.constant 0 : index
      %c0_29 = arith.constant 0 : index
      %47 = vector.load %arg6[%c0_28, %c0_29] : memref<8x1xf32, #tpu.memory_space<vmem>>, vector<8x1xf32>
      tpu.vector_store %arg6[%c0_28, %c0_29], %46 {strides = array<i32>} : memref<8x1xf32, #tpu.memory_space<vmem>>, vector<8x1xf32>,
      %cst_30 = arith.constant 0.000000e+00 : f32
      %48 = vector.broadcast %cst_30 : f32 to vector<8x128xf32>
      %c0_31 = arith.constant 0 : index
      %c0_32 = arith.constant 0 : index
      %49 = vector.load %arg4[%c0_31, %c0_32] : memref<8x128xf32, #tpu.memory_space<vmem>>, vector<8x128xf32>
      tpu.vector_store %arg4[%c0_31, %c0_32], %48 {strides = array<i32>} : memref<8x128xf32, #tpu.memory_space<vmem>>, vector<8x128xf32>,
    } else {
    }
    %c0 = arith.constant 0 : index
    %c0_1 = arith.constant 0 : index
    %3 = vector.load %arg2[%c0, %c0_1] : memref<8x128xf32, #tpu.memory_space<vmem>>, vector<8x128xf32>
    %c0_2 = arith.constant 0 : index
    %c0_3 = arith.constant 0 : index
    %c0_4 = arith.constant 0 : index
    %4 = vector.load %arg3[%c0_2, %c0_3, %c0_4] : memref<8x128x128xf32, #tpu.memory_space<vmem>>, vector<8x128x128xf32>
    %5 = vector.shape_cast %3 : vector<8x128xf32> to vector<8x1x128xf32>
    %6 = vector.broadcast %5 : vector<8x1x128xf32> to vector<8x128x128xf32>
    %7 = arith.mulf %4, %6 : vector<8x128x128xf32>
    %cst = arith.constant dense<0.000000e+00> : vector<8x128xf32>
    %8 = vector.multi_reduction <add>, %7, %cst [2] : vector<8x128x128xf32> to vector<8x128xf32>
    %9 = tpu.iota {dimensions = array<i32: 1>} : vector<8x128xi32>
    %c128_i32 = arith.constant 128 : i32
    %10 = arith.muli %arg1, %c128_i32 : i32
    %11 = vector.broadcast %10 : i32 to vector<8x128xi32>
    %12 = arith.addi %9, %11 : vector<8x128xi32>
    %c8_i32 = arith.constant 8 : i32
    %13 = vector.broadcast %c8_i32 : i32 to vector<8x128xi32>
    %14 = arith.cmpi slt, %12, %13 : vector<8x128xi32>
    %cst_5 = arith.constant 0xFF800000 : f32
    %15 = vector.broadcast %cst_5 : f32 to vector<8x128xf32>
    %16 = arith.select %14, %8, %15 : vector<8x128xi1>, vector<8x128xf32>
    %c0_6 = arith.constant 0 : index
    %c0_7 = arith.constant 0 : index
    %17 = vector.load %arg5[%c0_6, %c0_7] : memref<8x1xf32, #tpu.memory_space<vmem>>, vector<8x1xf32>
    %cst_8 = arith.constant dense<0xFF800000> : vector<8xf32>
    %18 = vector.multi_reduction <maximumf>, %16, %cst_8 [1] : vector<8x128xf32> to vector<8xf32>
    %19 = vector.shape_cast %18 : vector<8xf32> to vector<8x1xf32>
    %20 = arith.maximumf %17, %19 : vector<8x1xf32>
    %21 = arith.subf %17, %20 : vector<8x1xf32>
    %22 = math.exp %21 : vector<8x1xf32>
    %23 = vector.broadcast %20 : vector<8x1xf32> to vector<8x128xf32>
    %24 = arith.subf %16, %23 : vector<8x128xf32>
    %25 = math.exp %24 : vector<8x128xf32>
    %c0_9 = arith.constant 0 : index
    %c0_10 = arith.constant 0 : index
    %26 = vector.load %arg6[%c0_9, %c0_10] : memref<8x1xf32, #tpu.memory_space<vmem>>, vector<8x1xf32>
    %27 = arith.mulf %22, %26 : vector<8x1xf32>
    %cst_11 = arith.constant dense<0.000000e+00> : vector<8xf32>
    %28 = vector.multi_reduction <add>, %25, %cst_11 [1] : vector<8x128xf32> to vector<8xf32>
    %29 = vector.shape_cast %28 : vector<8xf32> to vector<8x1xf32>
    %30 = arith.addf %27, %29 : vector<8x1xf32>
    %c0_12 = arith.constant 0 : index
    %c0_13 = arith.constant 0 : index
    %31 = vector.load %arg6[%c0_12, %c0_13] : memref<8x1xf32, #tpu.memory_space<vmem>>, vector<8x1xf32>
    tpu.vector_store %arg6[%c0_12, %c0_13], %30 {strides = array<i32>} : memref<8x1xf32, #tpu.memory_space<vmem>>, vector<8x1xf32>,
    %c0_14 = arith.constant 0 : index
    %c0_15 = arith.constant 0 : index
    %32 = vector.load %arg5[%c0_14, %c0_15] : memref<8x1xf32, #tpu.memory_space<vmem>>, vector<8x1xf32>
    tpu.vector_store %arg5[%c0_14, %c0_15], %20 {strides = array<i32>} : memref<8x1xf32, #tpu.memory_space<vmem>>, vector<8x1xf32>,
    %c0_16 = arith.constant 0 : index
    %c0_17 = arith.constant 0 : index
    %33 = vector.load %arg4[%c0_16, %c0_17] : memref<8x128xf32, #tpu.memory_space<vmem>>, vector<8x128xf32>
    %34 = vector.broadcast %22 : vector<8x1xf32> to vector<8x128xf32>
    %35 = arith.mulf %33, %34 : vector<8x128xf32>
    %c0_18 = arith.constant 0 : index
    %c0_19 = arith.constant 0 : index
    %36 = vector.load %arg4[%c0_18, %c0_19] : memref<8x128xf32, #tpu.memory_space<vmem>>, vector<8x128xf32>
    tpu.vector_store %arg4[%c0_18, %c0_19], %35 {strides = array<i32>} : memref<8x128xf32, #tpu.memory_space<vmem>>, vector<8x128xf32>,
    %c128_i32_20 = arith.constant 128 : i32
    %37 = arith.muli %arg1, %c128_i32_20 : i32
    %38 = tpu.assume_multiple %37, 128 : i32
    %c0_21 = arith.constant 0 : index
    %39 = arith.index_cast %38 : i32 to index
    %40 = vector.load %arg4[%c0_21, %39] : memref<8x128xf32, #tpu.memory_space<vmem>>, vector<8x128xf32>
    tpu.vector_store %arg4[%c0_21, %39], %25 {strides = array<i32>} : memref<8x128xf32, #tpu.memory_space<vmem>>, vector<8x128xf32>,
    %c0_i32_22 = arith.constant 0 : i32
    %41 = arith.cmpi eq, %arg1, %c0_i32_22 : i32
    %42 = arith.extui %41 : i1 to i32
    %c0_i32_23 = arith.constant 0 : i32
    %43 = arith.cmpi ne, %42, %c0_i32_23 : i32
    scf.if %43 {
      %c0_24 = arith.constant 0 : index
      %c0_25 = arith.constant 0 : index
      %44 = vector.load %arg6[%c0_24, %c0_25] : memref<8x1xf32, #tpu.memory_space<vmem>>, vector<8x1xf32>
      %45 = tpu.reciprocal %44 : vector<8x1xf32> -> vector<8x1xf32>
      %c0_26 = arith.constant 0 : index
      %c0_27 = arith.constant 0 : index
      %46 = vector.load %arg4[%c0_26, %c0_27] : memref<8x128xf32, #tpu.memory_space<vmem>>, vector<8x128xf32>
      %47 = vector.broadcast %45 : vector<8x1xf32> to vector<8x128xf32>
      %48 = arith.mulf %46, %47 : vector<8x128xf32>
      %c0_28 = arith.constant 0 : index
      %c0_29 = arith.constant 0 : index
      %49 = vector.load %arg4[%c0_28, %c0_29] : memref<8x128xf32, #tpu.memory_space<vmem>>, vector<8x128xf32>
      tpu.vector_store %arg4[%c0_28, %c0_29], %48 {strides = array<i32>} : memref<8x128xf32, #tpu.memory_space<vmem>>, vector<8x128xf32>,
    } else {
    }
    return
  }
  func.func @transform_0(%arg0: i32, %arg1: i32) -> (i32, i32) {
    %c0_i32 = arith.constant 0 : i32
    %c0_i32_0 = arith.constant 0 : i32
    return %arg0, %c0_i32 : i32, i32
  }
  func.func @transform_1(%arg0: i32, %arg1: i32) -> (i32, i32, i32) {
    %c0_i32 = arith.constant 0 : i32
    %c0_i32_0 = arith.constant 0 : i32
    return %arg0, %arg1, %c0_i32 : i32, i32, i32
  }
  func.func @transform_2(%arg0: i32, %arg1: i32) -> (i32, i32) {
    %c0_i32 = arith.constant 0 : i32
    %c0_i32_0 = arith.constant 0 : i32
    return %arg0, %c0_i32 : i32, i32
  }
}

</mosaic_0001>

<bundles_post_ra>
// kernel: tpu_custom_call.1
= control target key start
LH: loop header
LB: loop body
LE: loop exit
PB: predicated region body
PF: predicated region fallthrough
CT: control target
= control target key end

     0   :  { %7 = vsyncpa [#allocation5], 0  ;;  %s2175_s0 = inlined_call_operand.hbm [shape: f32[8,128], index: 0, kind: input, shape index: {}]   ;;  %s2176_s1 = inlined_call_operand.hbm [shape: f32[8,128,128], index: 1, kind: input, shape index: {}]   ;;  %s2177_s2 = inlined_call_operand.hbm [shape: f32[8,128], index: 2, kind: output, shape index: {}]  }
   0x1   :  { %8 = vsyncpa [#allocation8], 0 }
   0x2   :  { %9 = vsyncpa [#allocation6], 0  ;;  %s1616_s9 = smov [#allocation4]   ;;  %s1617_s11 = smov [#allocation7]  }
   0x3   :  { %s16_s10 = sshll.u32 %s1616_s9, 4  ;;  %s25_s12 = sshll.u32 %s1617_s11, 4  ;;  %s17_s10 = int_to_ptr.vmem [resolvable:$true] %s16_s10  ;;  %s1640_s12 = int_to_ptr.vmem [resolvable:$true] %s25_s12 }
   0x4   :  { %s1544_s15 = scalar_lea.hbm %s2175_s0, 128 }
   0x5   :  { %p1545_p0 = scmp.ne.s32.totalorder %s2175_s0, %s1544_s15  ;;  %p1548_p1 = scmp.lt.u32.totalorder %s1544_s15, %s2175_s0 }
   0x7   :  { %p1550_p2 = pnand %p1548_p1, %p1545_p0 }
   0x9   :  { %1553 = shalt.err (!%p1550_p2)
}
   0xa   :  { %s1554_s20 = scalar_lea.vmem %s17_s10, 128  ;;  %p1559_p4 = scmp.lt.s32.totalorder %s17_s10, %s17_s10 }
   0xb   :  { %p1555_p3 = scmp.ne.s32.totalorder %s17_s10, %s1554_s20  ;;  %p1560_p5 = scmp.lt.s32.totalorder %s1554_s20, %s1554_s20 }
   0xd   :  { %p1561_p6 = por %p1560_p5, %p1559_p4 }
   0xf   :  { %p1562_p7 = pnand %p1561_p6, %p1555_p3 }
  0x11   :  { %1565 = shalt.err (!%p1562_p7)
}
  0x12   :  { %19 = dma.hbm_to_vmem [thread:$0]  %s2175_s0, 128, %s17_s10, [#allocation5]  }
  0x13   :  { %s1566_s25 = scalar_lea.hbm %s2176_s1, 16384 }
  0x14   :  { %p1567_p8 = scmp.ne.s32.totalorder %s2176_s1, %s1566_s25  ;;  %p1570_p9 = scmp.lt.u32.totalorder %s1566_s25, %s2176_s1 }
  0x16   :  { %p1572_p10 = pnand %p1570_p9, %p1567_p8 }
  0x18   :  { %1575 = shalt.err (!%p1572_p10)
}
  0x19   :  { %s1576_s30 = scalar_lea.vmem %s1640_s12, 16384  ;;  %p1581_p12 = scmp.lt.s32.totalorder %s1640_s12, %s1640_s12 }
  0x1a   :  { %p1577_p11 = scmp.ne.s32.totalorder %s1640_s12, %s1576_s30  ;;  %p1582_p13 = scmp.lt.s32.totalorder %s1576_s30, %s1576_s30 }
  0x1c   :  { %p1583_p0 = por %p1582_p13, %p1581_p12 }
  0x1e   :  { %p1584_p1 = pnand %p1583_p0, %p1577_p11 }
  0x20   :  { %1587 = shalt.err (!%p1584_p1)
}
  0x21   :  { %s1618_s0 = smov 128   ;;  %s1619_s3 = smov 8  }
  0x22   :  { %31 = dma.hbm_to_vmem [thread:$0]  %s2176_s1, 16384, %s1640_s12, [#allocation8], %s1618_s0, %s1618_s0, %s1619_s3  }
  0x23   :  { %1610 = dma.done.wait [#allocation5], 128  }
  0x24   :  { %1611 = vsyncadd [#allocation5], 4294967168 }
  0x25   :  { %1612 = dma.done.wait [#allocation8], 16384  }
  0x26   :  { %1613 = vsyncadd [#allocation8], 4294950912  ;;  %v180_v0 = vlaneseq  ;;  %v1620_v1 = vmov 1966171168   ;;  %v46_v6 = vld [vmem:[#allocation4] sm:$0xff]  ;;  %v47_v11 = vld [vmem:[#allocation7] sm:$0xff] }
  0x27   :  { %v178_v2 = vunpack.c.l.s4 %v1620_v1  ;;  %v63_v14 = vld [vmem:[#allocation7 + $0x80] sm:$0xff]  ;;  %v48_v15 = vld [vmem:[#allocation7 + $0x8] sm:$0xff]  ;;  %v49_v21 = vld [vmem:[#allocation7 + $0x10] sm:$0xff]  ;;  %v176_v37 = vcombine.high %v46_v6, %v46_v6  ;;  %vm792_vm0 = vcmask 130112   ;;  %vm799_vm1 = vcmask 195712   ;;  %s1624_s1 = smov [#allocation9]  }
  0x28   :  { %v1672_v3 = vshrl.u32 %v180_v0, 7  ;;  %v64_v18 = vld [vmem:[#allocation7 + $0x88] sm:$0xff]  ;;  %v65_v24 = vld [vmem:[#allocation7 + $0x90] sm:$0xff]  ;;  %v50_v26 = vld [vmem:[#allocation7 + $0x18] sm:$0xff]  ;;  %vm806_vm2 = vcmask 261312   ;;  %vm813_vm3 = vcmask 326912  }
  0x29   :  { %v179_v4 = vunpack.c.0.s8 %v178_v2  ;;  %v80_v29 = vld [vmem:[#allocation7 + $0x108] sm:$0xff]  ;;  %v79_v31 = vld [vmem:[#allocation7 + $0x100] sm:$0xff]  ;;  %v66_v34 = vld [vmem:[#allocation7 + $0x98] sm:$0xff]  ;;  %vm820_vm4 = vcmask 392512   ;;  %vm827_vm5 = vcmask 458112   ;;  %vm834_vm6 = vcmask 523712  }
  0x2a   :  { %v1679_v8 = vsub.s32 0, %v1672_v3  ;;  %v81_v36 = vld [vmem:[#allocation7 + $0x110] sm:$0xff]  ;;  %v95_v40 = vld [vmem:[#allocation7 + $0x180] sm:$0xff]  ;;  %v96_v42 = vld [vmem:[#allocation7 + $0x188] sm:$0xff]  ;;  %vm841_vm7 = vcmask 589312   ;;  %vm848_vm8 = vcmask 654912  }
  0x2b   :  { %v1675_v5 = vsub.s32 %v179_v4, %v1672_v3  ;;  %v51_v45 = vld [vmem:[#allocation7 + $0x20] sm:$0xff]  ;;  %v82_v50 = vld [vmem:[#allocation7 + $0x118] sm:$0xff]  ;;  %v97_v52 = vld [vmem:[#allocation7 + $0x190] sm:$0xff]  ;;  %vm855_vm9 = vcmask 720512   ;;  %vm42_vm10 = vcmask 7168   ;;  %vm862_vm11 = vcmask 786112  }
  0x2c   :  { %v67_v47 = vld [vmem:[#allocation7 + $0xa0] sm:$0xff]  ;;  %v112_v57 = vld [vmem:[#allocation7 + $0x208] sm:$0xff]  ;;  %vm869_vm12 = vcmask 851712   ;;  %vm876_vm13 = vcmask 917312   ;;  %vm883_vm14 = vcmask 982912   ;;  %vm890_vm15 = vcmask 1048512  }
  0x2d   :  { %v183_v7 = vrot.slane %v46_v6, %v1675_v5  ;;  %v190_v44 = vrot.slane %v176_v37, %v1675_v5  ;;  %v111_v55 = vld [vmem:[#allocation7 + $0x200] sm:$0xff]  ;;  %v52_v59 = vld [vmem:[#allocation7 + $0x28] sm:$0xff]  ;;  %v98_v6 = vld [vmem:[#allocation7 + $0x198] sm:$0xff]  ;;  %s1515_s6 = sshll.u32 %s1624_s1, 4  ;;  %s1516_s6 = int_to_ptr.vmem [resolvable:$true] %s1515_s6 }
  0x2e   :  { %v68_v62 = vld [vmem:[#allocation7 + $0xa8] sm:$0xff]  ;;  %v83_v1 = vld [vmem:[#allocation7 + $0x120] sm:$0xff]  ;;  %s1588_s7 = scalar_lea.vmem %s1516_s6, 128  ;;  %p1593_p3 = scmp.lt.s32.totalorder %s1516_s6, %s1516_s6 }
  0x2f   :  { %v199_v9 = vrot.slane %v183_v7, %v1675_v5  ;;  %v191_v10 = vcombine.high %v183_v7, %v183_v7  ;;  %v206_v49 = vrot.slane %v190_v44, %v1675_v5  ;;  %v192_v61 = vcombine.high %v190_v44, %v190_v44  ;;  %p1589_p2 = scmp.ne.s32.totalorder %s1516_s6, %s1588_s7  ;;  %p1594_p4 = scmp.lt.s32.totalorder %s1588_s7, %s1588_s7 }
  0x31   :  { %v1683_v12 = vrot.slane %v199_v9, %v1679_v8  ;;  %v213_v13 = vrot.slane %v191_v10, %v1675_v5  ;;  %v221_v23 = vcombine.high %v199_v9, %v199_v9  ;;  %v1714_v54 = vrot.slane %v206_v49, %v1679_v8  ;;  %v113_v9 = vld [vmem:[#allocation7 + $0x210] sm:$0xff]  ;;  %p1595_p5 = por %p1594_p4, %p1593_p3 }
  0x32   :  { %v1722_v4 = vrot.slane %v192_v61, %v1675_v5 }
  0x33   :  { %v265_v16 = vmul.f32 %v1683_v12, %v47_v11  ;;  %v1688_v17 = vrot.slane %v213_v13, %v1679_v8  ;;  %v266_v20 = vmul.f32 %v1683_v12, %v48_v15  ;;  %v267_v25 = vmul.f32 %v1683_v12, %v49_v21  ;;  %v128_v15 = vld [vmem:[#allocation7 + $0x288] sm:$0xff]  ;;  %p1596_p6 = pnand %p1595_p5, %p1589_p2 }
  0x34   :  { %v1696_v28 = vrot.slane %v221_v23, %v1679_v8  ;;  %v268_v30 = vmul.f32 %v1683_v12, %v50_v26  ;;  %v223_v33 = vcombine.high %v213_v13, %v213_v13  ;;  %v269_v48 = vmul.f32 %v1683_v12, %v51_v45  ;;  %v127_v13 = vld [vmem:[#allocation7 + $0x280] sm:$0xff]  ;;  %v84_v21 = vld [vmem:[#allocation7 + $0x128] sm:$0xff]  ;;  %v114_v26 = vld [vmem:[#allocation7 + $0x218] sm:$0xff] }
  0x35   :  { %393 = vadd.xlane.f32.xlu0 %v265_v16  ;;  %v281_v19 = vmul.f32 %v1688_v17, %v63_v14  ;;  %v282_v22 = vmul.f32 %v1688_v17, %v64_v18  ;;  %v283_v27 = vmul.f32 %v1688_v17, %v65_v24  ;;  %v284_v38 = vmul.f32 %v1688_v17, %v66_v34  ;;  %v53_v16 = vld [vmem:[#allocation7 + $0x30] sm:$0xff]  ;;  %v99_v23 = vld [vmem:[#allocation7 + $0x1a0] sm:$0xff]  ;;  %v144_v34 = vld [vmem:[#allocation7 + $0x308] sm:$0xff] }
  0x36   :  { %v298_v32 = vmul.f32 %v1696_v28, %v80_v29  ;;  %v297_v35 = vmul.f32 %v1696_v28, %v79_v31  ;;  %v1703_v39 = vrot.slane %v223_v33, %v1679_v8  ;;  %v299_v41 = vmul.f32 %v1696_v28, %v81_v36  ;;  %v129_v29 = vld [vmem:[#allocation7 + $0x290] sm:$0xff]  ;;  %v54_v36 = vld [vmem:[#allocation7 + $0x38] sm:$0xff]  ;;  %v115_v45 = vld [vmem:[#allocation7 + $0x220] sm:$0xff] }
  0x37   :  { %425 = vadd.xlane.f32.xlu1 %v281_v19  ;;  %v285_v51 = vmul.f32 %v1688_v17, %v67_v47  ;;  %v300_v53 = vmul.f32 %v1696_v28, %v82_v50  ;;  %v329_v58 = vmul.f32 %v1714_v54, %v111_v55  ;;  %v330_v60 = vmul.f32 %v1714_v54, %v112_v57  ;;  %v69_v19 = vld [vmem:[#allocation7 + $0xb0] sm:$0xff] }
  0x38   :  { %v313_v43 = vmul.f32 %v1703_v39, %v95_v40  ;;  %v314_v46 = vmul.f32 %v1703_v39, %v96_v42  ;;  %v315_v56 = vmul.f32 %v1703_v39, %v97_v52  ;;  %v270_v63 = vmul.f32 %v1683_v12, %v52_v59  ;;  %v145_v50 = vld [vmem:[#allocation7 + $0x310] sm:$0xff] }
  0x39   :  { %395 = vadd.xlane.f32.xlu0 %v266_v20  ;;  %v286_v2 = vmul.f32 %v1688_v17, %v68_v62  ;;  %v301_v7 = vmul.f32 %v1696_v28, %v83_v1  ;;  %v316_v10 = vmul.f32 %v1703_v39, %v98_v6  ;;  %v1728_v11 = vrot.slane %v1722_v4, %v1679_v8  ;;  %v86_v62 = vld [vmem:[#allocation7 + $0x138] sm:$0xff]  ;;  %v131_v6 = vld [vmem:[#allocation7 + $0x2a0] sm:$0xff] }
  0x3a   :  { %v331_v14 = vmul.f32 %v1714_v54, %v113_v9  ;;  %v271_v20 = vmul.f32 %v1683_v12, %v53_v16  ;;  %v302_v24 = vmul.f32 %v1696_v28, %v84_v21  ;;  %v272_v40 = vmul.f32 %v1683_v12, %v54_v36  ;;  %v146_v9 = vld [vmem:[#allocation7 + $0x318] sm:$0xff]  ;;  %v72_v16 = vld [vmem:[#allocation7 + $0xc8] sm:$0xff] }
  0x3b   :  { %427 = vadd.xlane.f32.xlu1 %v282_v22  ;;  %v345_v5 = vmul.f32 %v1728_v11, %v127_v13  ;;  %v346_v18 = vmul.f32 %v1728_v11, %v128_v15  ;;  %v287_v22 = vmul.f32 %v1688_v17, %v69_v19  ;;  %v347_v33 = vmul.f32 %v1728_v11, %v129_v29  ;;  %v161_v13 = vld [vmem:[#allocation7 + $0x390] sm:$0xff]  ;;  %v56_v15 = vld [vmem:[#allocation7 + $0x48] sm:$0xff]  ;;  %v87_v19 = vld [vmem:[#allocation7 + $0x140] sm:$0xff] }
  0x3c   :  { %v224_v47 = vcombine.high %v1722_v4, %v1722_v4  ;;  %v304_v1 = vmul.f32 %v1696_v28, %v86_v62  ;;  %v102_v21 = vld [vmem:[#allocation7 + $0x1b8] sm:$0xff] }
  0x3d   :  { %397 = vadd.xlane.f32.xlu0 %v267_v25  ;;  %v222_v25 = vcombine.high %v206_v49, %v206_v49  ;;  %v333_v49 = vmul.f32 %v1714_v54, %v115_v45 }
  0x3e   :  { %v1753_v52 = vrot.slane %v224_v47, %v1679_v8 }
  0x3f   :  { %429 = vadd.xlane.f32.xlu1 %v283_v27  ;;  %v317_v27 = vmul.f32 %v1703_v39, %v99_v23  ;;  %v1739_v31 = vrot.slane %v222_v25, %v1679_v8  ;;  %v117_v23 = vld [vmem:[#allocation7 + $0x230] sm:$0xff]  ;;  %v132_v25 = vld [vmem:[#allocation7 + $0x2a8] sm:$0xff] }
  0x40   :  { %v350_v29 = vmul.f32 %v1728_v11, %v132_v25 }
  0x41   :  { %399 = vadd.xlane.f32.xlu0 %v268_v30  ;;  %v332_v30 = vmul.f32 %v1714_v54, %v114_v26  ;;  %v362_v37 = vmul.f32 %v1739_v31, %v144_v34  ;;  %v363_v55 = vmul.f32 %v1739_v31, %v145_v50  ;;  %v335_v26 = vmul.f32 %v1714_v54, %v117_v23  ;;  %v58_v50 = vld [vmem:[#allocation7 + $0x58] sm:$0xff] }
  0x43   :  { %459 = vadd.xlane.f32.xlu1 %v298_v32  ;;  %v143_v32 = vld [vmem:[#allocation7 + $0x300] sm:$0xff] }
  0x45   :  { %457 = vadd.xlane.f32.xlu0 %v297_v35  ;;  %v361_v35 = vmul.f32 %v1739_v31, %v143_v32 }
  0x47   :  { %431 = vadd.xlane.f32.xlu1 %v284_v38  ;;  %v70_v38 = vld [vmem:[#allocation7 + $0xb8] sm:$0xff] }
  0x48   :  { %v288_v42 = vmul.f32 %v1688_v17, %v70_v38 }
  0x49   :  { %461 = vadd.xlane.f32.xlu0 %v299_v41  ;;  %v85_v41 = vld [vmem:[#allocation7 + $0x130] sm:$0xff] }
  0x4a   :  { %v303_v44 = vmul.f32 %v1696_v28, %v85_v41 }
  0x4b   :  { %489 = vadd.xlane.f32.xlu1 %v313_v43  ;;  %v100_v43 = vld [vmem:[#allocation7 + $0x1a8] sm:$0xff] }
  0x4d   :  { %491 = vadd.xlane.f32.xlu0 %v314_v46  ;;  %v318_v46 = vmul.f32 %v1703_v39, %v100_v43 }
  0x4f   :  { %401 = vadd.xlane.f32.xlu1 %v269_v48  ;;  %v130_v48 = vld [vmem:[#allocation7 + $0x298] sm:$0xff] }
  0x51   :  { %433 = vadd.xlane.f32.xlu0 %v285_v51  ;;  %v348_v51 = vmul.f32 %v1728_v11, %v130_v48  ;;  %v163_v48 = vld [vmem:[#allocation7 + $0x3a0] sm:$0xff] }
  0x53   :  { %463 = vadd.xlane.f32.xlu1 %v300_v53  ;;  %v159_v53 = vld [vmem:[#allocation7 + $0x380] sm:$0xff] }
  0x54   :  { %v377_v57 = vmul.f32 %v1753_v52, %v159_v53  ;;  %v74_v53 = vld [vmem:[#allocation7 + $0xd8] sm:$0xff] }
  0x55   :  { %493 = vadd.xlane.f32.xlu0 %v315_v56  ;;  %v160_v56 = vld [vmem:[#allocation7 + $0x388] sm:$0xff] }
  0x56   :  { %v378_v59 = vmul.f32 %v1753_v52, %v160_v56  ;;  %v89_v56 = vld [vmem:[#allocation7 + $0x150] sm:$0xff] }
  0x57   :  { %521 = vadd.xlane.f32.xlu1 %v329_v58  ;;  %v55_v58 = vld [vmem:[#allocation7 + $0x40] sm:$0xff] }
  0x58   :  { %v273_v61 = vmul.f32 %v1683_v12, %v55_v58  ;;  %v104_v58 = vld [vmem:[#allocation7 + $0x1c8] sm:$0xff] }
  0x59   :  { %523 = vadd.xlane.f32.xlu0 %v330_v60  ;;  %v71_v60 = vld [vmem:[#allocation7 + $0xc0] sm:$0xff]  ;;  %v322_v62 = vmul.f32 %v1703_v39, %v104_v58 }
  0x5a   :  { %v289_v8 = vmul.f32 %v1688_v17, %v71_v60  ;;  %v1786_v60 = vand.u32 127, %v180_v0 }
  0x5b   :  { %403 = vadd.xlane.f32.xlu1 %v270_v63  ;;  %v101_v63 = vld [vmem:[#allocation7 + $0x1b0] sm:$0xff] }
  0x5c   :  { %v319_v4 = vmul.f32 %v1703_v39, %v101_v63  ;;  %v1791_v63 = vsub.s32 %v1786_v60, %v1672_v3 }
  0x5d   :  { %435 = vadd.xlane.f32.xlu0 %v286_v2  ;;  %v116_v2 = vld [vmem:[#allocation7 + $0x228] sm:$0xff] }
  0x5f   :  { %465 = vadd.xlane.f32.xlu1 %v301_v7  ;;  %v334_v7 = vmul.f32 %v1714_v54, %v116_v2  ;;  %v787_v2 = vadd.s32 4294967288, %v1786_v60 }
  0x61   :  { %495 = vadd.xlane.f32.xlu0 %v316_v10  ;;  %v349_v10 = vmul.f32 %v1728_v11, %v131_v6 }
  0x63   :  { %525 = vadd.xlane.f32.xlu1 %v331_v14  ;;  %v364_v14 = vmul.f32 %v1739_v31, %v146_v9 }
  0x65   :  { %553 = vadd.xlane.f32.xlu0 %v345_v5  ;;  %v379_v5 = vmul.f32 %v1753_v52, %v161_v13 }
  0x67   :  { %555 = vadd.xlane.f32.xlu1 %v346_v18  ;;  %v274_v18 = vmul.f32 %v1683_v12, %v56_v15 }
  0x69   :  { %405 = vadd.xlane.f32.xlu0 %v271_v20  ;;  %v290_v20 = vmul.f32 %v1688_v17, %v72_v16 }
  0x6b   :  { %437 = vadd.xlane.f32.xlu1 %v287_v22  ;;  %v305_v22 = vmul.f32 %v1696_v28, %v87_v19 }
  0x6d   :  { %467 = vadd.xlane.f32.xlu0 %v302_v24  ;;  %v320_v24 = vmul.f32 %v1703_v39, %v102_v21 }
  0x6f   :  { %497 = vadd.xlane.f32.xlu1 %v317_v27  ;;  %v147_v27 = vld [vmem:[#allocation7 + $0x320] sm:$0xff] }
  0x70   :  { %v365_v32 = vmul.f32 %v1739_v31, %v147_v27 }
  0x71   :  { %527 = vadd.xlane.f32.xlu0 %v332_v30  ;;  %v162_v30 = vld [vmem:[#allocation7 + $0x398] sm:$0xff] }
  0x72   :  { %v380_v34 = vmul.f32 %v1753_v52, %v162_v30 }
  0x73   :  { %557 = vadd.xlane.f32.xlu1 %v347_v33  ;;  %v57_v33 = vld [vmem:[#allocation7 + $0x50] sm:$0xff] }
  0x74   :  { %v275_v36 = vmul.f32 %v1683_v12, %v57_v33  ;;  %v105_v33 = vld [vmem:[#allocation7 + $0x1d0] sm:$0xff] }
  0x75   :  { %585 = vadd.xlane.f32.xlu0 %v361_v35  ;;  %v73_v35 = vld [vmem:[#allocation7 + $0xd0] sm:$0xff] }
  0x76   :  { %v291_v38 = vmul.f32 %v1688_v17, %v73_v35 }
  0x77   :  { %587 = vadd.xlane.f32.xlu1 %v362_v37  ;;  %v88_v37 = vld [vmem:[#allocation7 + $0x148] sm:$0xff] }
  0x78   :  { %v306_v41 = vmul.f32 %v1696_v28, %v88_v37 }
  0x79   :  { %407 = vadd.xlane.f32.xlu0 %v272_v40  ;;  %v103_v40 = vld [vmem:[#allocation7 + $0x1c0] sm:$0xff] }
  0x7a   :  { %v321_v43 = vmul.f32 %v1703_v39, %v103_v40  ;;  %v120_v40 = vld [vmem:[#allocation7 + $0x248] sm:$0xff] }
  0x7b   :  { %439 = vadd.xlane.f32.xlu1 %v288_v42  ;;  %v118_v42 = vld [vmem:[#allocation7 + $0x238] sm:$0xff] }
  0x7c   :  { %v336_v45 = vmul.f32 %v1714_v54, %v118_v42 }
  0x7d   :  { %469 = vadd.xlane.f32.xlu0 %v303_v44  ;;  %v133_v44 = vld [vmem:[#allocation7 + $0x2b0] sm:$0xff] }
  0x7e   :  { %v351_v47 = vmul.f32 %v1728_v11, %v133_v44 }
  0x7f   :  { %499 = vadd.xlane.f32.xlu1 %v318_v46  ;;  %v148_v46 = vld [vmem:[#allocation7 + $0x328] sm:$0xff] }
  0x81   :  { %529 = vadd.xlane.f32.xlu0 %v333_v49  ;;  %v366_v49 = vmul.f32 %v1739_v31, %v148_v46 }
  0x83   :  { %559 = vadd.xlane.f32.xlu1 %v348_v51  ;;  %v381_v51 = vmul.f32 %v1753_v52, %v163_v48  ;;  %v338_v48 = vmul.f32 %v1714_v54, %v120_v40  ;;  %v151_v40 = vld [vmem:[#allocation7 + $0x340] sm:$0xff] }
  0x85   :  { %589 = vadd.xlane.f32.xlu0 %v363_v55  ;;  %v276_v55 = vmul.f32 %v1683_v12, %v58_v50  ;;  %v150_v50 = vld [vmem:[#allocation7 + $0x338] sm:$0xff] }
  0x87   :  { %617 = vadd.xlane.f32.xlu1 %v377_v57  ;;  %v292_v57 = vmul.f32 %v1688_v17, %v74_v53 }
  0x89   :  { %619 = vadd.xlane.f32.xlu0 %v378_v59  ;;  %v307_v59 = vmul.f32 %v1696_v28, %v89_v56 }
  0x8b   :  { %409 = vadd.xlane.f32.xlu1 %v273_v61  ;;  %v119_v61 = vld [vmem:[#allocation7 + $0x240] sm:$0xff] }
  0x8d   :  { %441 = vadd.xlane.f32.xlu0 %v289_v8  ;;  %v134_v8 = vld [vmem:[#allocation7 + $0x2b8] sm:$0xff] }
  0x8e   :  { %v352_v6 = vmul.f32 %v1728_v11, %v134_v8 }
  0x8f   :  { %471 = vadd.xlane.f32.xlu1 %v304_v1  ;;  %v337_v1 = vmul.f32 %v1714_v54, %v119_v61 }
  0x91   :  { %501 = vadd.xlane.f32.xlu0 %v319_v4  ;;  %v149_v4 = vld [vmem:[#allocation7 + $0x330] sm:$0xff] }
  0x92   :  { %v367_v13 = vmul.f32 %v1739_v31, %v149_v4  ;;  %v808_v4 = vadd.s32 4294967264, %v1786_v60 }
  0x93   :  { %531 = vadd.xlane.f32.xlu1 %v334_v7  ;;  %v164_v7 = vld [vmem:[#allocation7 + $0x3a8] sm:$0xff] }
  0x95   :  { %561 = vadd.xlane.f32.xlu0 %v349_v10  ;;  %v1798_v10 = vsub.s32 %v787_v2, %v1672_v3 }
  0x97   :  { %591 = vadd.xlane.f32.xlu1 %v364_v14  ;;  %v794_v14 = vadd.s32 4294967280, %v1786_v60 }
  0x99   :  { %621 = vadd.xlane.f32.xlu0 %v379_v5  ;;  %v59_v5 = vld [vmem:[#allocation7 + $0x60] sm:$0xff] }
  0x9a   :  { %v277_v23 = vmul.f32 %v1683_v12, %v59_v5 }
  0x9b   :  { %411 = vadd.xlane.f32.xlu1 %v274_v18  ;;  %v382_v18 = vmul.f32 %v1753_v52, %v164_v7 }
  0x9d   :  { %443 = vadd.xlane.f32.xlu0 %v290_v20  ;;  %v75_v20 = vld [vmem:[#allocation7 + $0xe0] sm:$0xff] }
  0x9e   :  { %v293_v30 = vmul.f32 %v1688_v17, %v75_v20 }
  0x9f   :  { %473 = vadd.xlane.f32.xlu1 %v305_v22  ;;  %v1806_v22 = vsub.s32 %v794_v14, %v1672_v3 }
  0xa1   :  { %503 = vadd.xlane.f32.xlu0 %v320_v24  ;;  %v801_v24 = vadd.s32 4294967272, %v1786_v60 }
  0xa3   :  { %533 = vadd.xlane.f32.xlu1 %v335_v26  ;;  %v90_v26 = vld [vmem:[#allocation7 + $0x158] sm:$0xff] }
  0xa4   :  { %v308_v37 = vmul.f32 %v1696_v28, %v90_v26  ;;  %v121_v26 = vld [vmem:[#allocation7 + $0x250] sm:$0xff] }
  0xa5   :  { %563 = vadd.xlane.f32.xlu0 %v350_v29 }
  0xa7   :  { %593 = vadd.xlane.f32.xlu1 %v365_v32 }
  0xa9   :  { %623 = vadd.xlane.f32.xlu0 %v380_v34 }
  0xab   :  { %413 = vadd.xlane.f32.xlu1 %v275_v36  ;;  %v1816_v36 = vsub.s32 %v801_v24, %v1672_v3 }
  0xad   :  { %445 = vadd.xlane.f32.xlu0 %v291_v38 }
  0xaf   :  { %475 = vadd.xlane.f32.xlu1 %v306_v41 }
  0xb1   :  { %505 = vadd.xlane.f32.xlu0 %v321_v43  ;;  %v323_v43 = vmul.f32 %v1703_v39, %v105_v33  ;;  %v136_v33 = vld [vmem:[#allocation7 + $0x2c8] sm:$0xff] }
  0xb3   :  { %535 = vadd.xlane.f32.xlu1 %v336_v45  ;;  %v135_v45 = vld [vmem:[#allocation7 + $0x2c0] sm:$0xff] }
  0xb5   :  { %565 = vadd.xlane.f32.xlu0 %v351_v47 }
  0xb7   :  { %595 = vadd.xlane.f32.xlu1 %v366_v49 }
  0xb9   :  { %625 = vadd.xlane.f32.xlu0 %v381_v51 }
  0xbb   :  { %415 = vadd.xlane.f32.xlu1 %v276_v55  ;;  %v353_v55 = vmul.f32 %v1728_v11, %v135_v45 }
  0xbd   :  { %447 = vadd.xlane.f32.xlu0 %v292_v57  ;;  %v165_v57 = vld [vmem:[#allocation7 + $0x3b0] sm:$0xff] }
  0xbe   :  { %v383_v2 = vmul.f32 %v1753_v52, %v165_v57 }
  0xbf   :  { %477 = vadd.xlane.f32.xlu1 %v307_v59  ;;  %v368_v59 = vmul.f32 %v1739_v31, %v150_v50 }
  0xc1   :  { %507 = vadd.xlane.f32.xlu0 %v322_v62  ;;  %v60_v62 = vld [vmem:[#allocation7 + $0x68] sm:$0xff] }
  0xc2   :  { %v394_v0 = vpop.xlane.xlu0 %393 }
  0xc3   :  { %v786_v9 = vrot.slane %v394_v0, %v1791_v63  ;;  %537 = vadd.xlane.f32.xlu1 %v337_v1  ;;  %v76_v0 = vld [vmem:[#allocation7 + $0xe8] sm:$0xff] }
  0xc4   :  { %v426_v15 = vpop.xlane.xlu1 %425 }
  0xc5   :  { %v895_v16 = vrot.slane %v426_v15, %v1791_v63  ;;  %567 = vadd.xlane.f32.xlu0 %v352_v6  ;;  %v91_v15 = vld [vmem:[#allocation7 + $0x160] sm:$0xff] }
  0xc6   :  { %v396_v19 = vpop.xlane.xlu0 %395  ;;  %v309_v24 = vmul.f32 %v1696_v28, %v91_v15 }
  0xc7   :  { %v791_v21 = vrot.slane %v396_v19, %v1798_v10  ;;  %597 = vadd.xlane.f32.xlu1 %v367_v13  ;;  %v278_v13 = vmul.f32 %v1683_v12, %v60_v62  ;;  %v294_v19 = vmul.f32 %v1688_v17, %v76_v0 }
  0xc8   :  { %v428_v25 = vpop.xlane.xlu1 %427 }
  0xc9   :  { %v793_v27 = vsel %vm792_vm0, %v791_v21, %v786_v9  ;;  %v899_v29 = vrot.slane %v428_v25, %v1798_v10  ;;  %627 = vadd.xlane.f32.xlu0 %v382_v18  ;;  %v1840_v18 = vsub.s32 %v808_v4, %v1672_v3  ;;  %v106_v21 = vld [vmem:[#allocation7 + $0x1d8] sm:$0xff] }
  0xca   :  { %v398_v32 = vpop.xlane.xlu0 %397 }
  0xcb   :  { %v900_v34 = vsel %vm792_vm0, %v899_v29, %v895_v16  ;;  %v798_v35 = vrot.slane %v398_v32, %v1806_v22  ;;  %417 = vadd.xlane.f32.xlu1 %v277_v23 }
  0xcc   :  { %v430_v38 = vpop.xlane.xlu1 %429 }
  0xcd   :  { %v800_v41 = vsel %vm799_vm1, %v798_v35, %v793_v27  ;;  %v904_v42 = vrot.slane %v430_v38, %v1806_v22  ;;  %449 = vadd.xlane.f32.xlu0 %v293_v30  ;;  %v324_v30 = vmul.f32 %v1703_v39, %v106_v21 }
  0xce   :  { %v400_v44 = vpop.xlane.xlu0 %399 }
  0xcf   :  { %v905_v46 = vsel %vm799_vm1, %v904_v42, %v900_v34  ;;  %v805_v47 = vrot.slane %v400_v44, %v1816_v36  ;;  %479 = vadd.xlane.f32.xlu1 %v308_v37  ;;  %v339_v37 = vmul.f32 %v1714_v54, %v121_v26  ;;  %v815_v44 = vadd.s32 4294967256, %v1786_v60 }
  0xd0   :  { %v460_v49 = vpop.xlane.xlu1 %459 }
  0xd1   :  { %v807_v51 = vsel %vm806_vm2, %v805_v47, %v800_v41  ;;  %v978_v53 = vrot.slane %v460_v49, %v1798_v10  ;;  %509 = vadd.xlane.f32.xlu0 %v323_v43  ;;  %v354_v43 = vmul.f32 %v1728_v11, %v136_v33  ;;  %v369_v49 = vmul.f32 %v1739_v31, %v151_v40 }
  0xd2   :  { %v458_v56 = vpop.xlane.xlu0 %457 }
  0xd3   :  { %v974_v58 = vrot.slane %v458_v56, %v1791_v63  ;;  %539 = vadd.xlane.f32.xlu1 %v338_v48  ;;  %v1861_v56 = vsub.s32 %v815_v44, %v1672_v3  ;;  %v62_v44 = vld [vmem:[#allocation7 + $0x78] sm:$0xff] }
  0xd4   :  { %v432_v61 = vpop.xlane.xlu1 %431 }
  0xd5   :  { %v979_v8 = vsel %vm792_vm0, %v978_v53, %v974_v58  ;;  %v909_v1 = vrot.slane %v432_v61, %v1816_v36  ;;  %569 = vadd.xlane.f32.xlu0 %v353_v55 }
  0xd6   :  { %v462_v6 = vpop.xlane.xlu0 %461 }
  0xd7   :  { %v910_v7 = vsel %vm806_vm2, %v909_v1, %v905_v46  ;;  %v983_v9 = vrot.slane %v462_v6, %v1806_v22  ;;  %599 = vadd.xlane.f32.xlu1 %v368_v59  ;;  %v166_v46 = vld [vmem:[#allocation7 + $0x3b8] sm:$0xff]  ;;  %v77_v59 = vld [vmem:[#allocation7 + $0xf0] sm:$0xff]  ;;  %v92_v1 = vld [vmem:[#allocation7 + $0x168] sm:$0xff] }
  0xd8   :  { %v490_v14 = vpop.xlane.xlu1 %489  ;;  %v384_v57 = vmul.f32 %v1753_v52, %v166_v46  ;;  %v295_v6 = vmul.f32 %v1688_v17, %v77_v59 }
  0xd9   :  { %v984_v5 = vsel %vm799_vm1, %v983_v9, %v979_v8  ;;  %v1053_v16 = vrot.slane %v490_v14, %v1791_v63  ;;  %629 = vadd.xlane.f32.xlu0 %v383_v2  ;;  %v310_v14 = vmul.f32 %v1696_v28, %v92_v1 }
  0xda   :  { %v492_v20 = vpop.xlane.xlu0 %491 }
  0xdb   :  { %v1057_v23 = vrot.slane %v492_v20, %v1798_v10  ;;  %419 = vadd.xlane.f32.xlu1 %v278_v13 }
  0xdc   :  { %v402_v25 = vpop.xlane.xlu1 %401 }
  0xdd   :  { %v1058_v27 = vsel %vm792_vm0, %v1057_v23, %v1053_v16  ;;  %v812_v29 = vrot.slane %v402_v25, %v1840_v18  ;;  %451 = vadd.xlane.f32.xlu0 %v294_v19  ;;  %v137_v23 = vld [vmem:[#allocation7 + $0x2d0] sm:$0xff] }
  0xde   :  { %v434_v32 = vpop.xlane.xlu0 %433 }
  0xdf   :  { %v814_v34 = vsel %vm813_vm3, %v812_v29, %v807_v51  ;;  %v914_v35 = vrot.slane %v434_v32, %v1840_v18  ;;  %481 = vadd.xlane.f32.xlu1 %v309_v24  ;;  %v61_v51 = vld [vmem:[#allocation7 + $0x70] sm:$0xff] }
  0xe0   :  { %v464_v38 = vpop.xlane.xlu1 %463  ;;  %v279_v62 = vmul.f32 %v1683_v12, %v61_v51  ;;  %v280_v51 = vmul.f32 %v1683_v12, %v62_v44  ;;  %v123_v12 = vld [vmem:[#allocation7 + $0x260] sm:$0xff] }
  0xe1   :  { %v915_v41 = vsel %vm813_vm3, %v914_v35, %v910_v7  ;;  %v988_v42 = vrot.slane %v464_v38, %v1816_v36  ;;  %511 = vadd.xlane.f32.xlu0 %v324_v30  ;;  %v107_v7 = vld [vmem:[#allocation7 + $0x1e0] sm:$0xff]  ;;  %v152_v30 = vld [vmem:[#allocation7 + $0x348] sm:$0xff] }
  0xe2   :  { %v494_v45 = vpop.xlane.xlu0 %493  ;;  %v325_v20 = vmul.f32 %v1703_v39, %v107_v7 }
  0xe3   :  { %v989_v47 = vsel %vm806_vm2, %v988_v42, %v984_v5  ;;  %v1062_v48 = vrot.slane %v494_v45, %v1806_v22  ;;  %541 = vadd.xlane.f32.xlu1 %v339_v37  ;;  %v122_v5 = vld [vmem:[#allocation7 + $0x258] sm:$0xff]  ;;  %v167_v37 = vld [vmem:[#allocation7 + $0x3c0] sm:$0xff]  ;;  %v370_v42 = vmul.f32 %v1739_v31, %v152_v30 }
  0xe4   :  { %v522_v50 = vpop.xlane.xlu1 %521  ;;  %v340_v26 = vmul.f32 %v1714_v54, %v122_v5  ;;  %v385_v46 = vmul.f32 %v1753_v52, %v167_v37  ;;  %v829_v5 = vadd.s32 4294967240, %v1786_v60 }
  0xe5   :  { %v1063_v53 = vsel %vm799_vm1, %v1062_v48, %v1058_v27  ;;  %v1132_v55 = vrot.slane %v522_v50, %v1791_v63  ;;  %571 = vadd.xlane.f32.xlu0 %v354_v43  ;;  %v822_v27 = vadd.s32 4294967248, %v1786_v60  ;;  %v78_v48 = vld [vmem:[#allocation7 + $0xf8] sm:$0xff] }
  0xe6   :  { %v524_v58 = vpop.xlane.xlu0 %523  ;;  %v296_v59 = vmul.f32 %v1688_v17, %v78_v48  ;;  %v138_v17 = vld [vmem:[#allocation7 + $0x2d8] sm:$0xff] }
  0xe7   :  { %v1136_v61 = vrot.slane %v524_v58, %v1798_v10  ;;  %601 = vadd.xlane.f32.xlu1 %v369_v49 }
  0xe8   :  { %v404_v8 = vpop.xlane.xlu1 %403 }
  0xe9   :  { %v1137_v2 = vsel %vm792_vm0, %v1136_v61, %v1132_v55  ;;  %v819_v4 = vrot.slane %v404_v8, %v1861_v56  ;;  %631 = vadd.xlane.f32.xlu0 %v384_v57  ;;  %v93_v55 = vld [vmem:[#allocation7 + $0x170] sm:$0xff] }
  0xea   :  { %v436_v0 = vpop.xlane.xlu0 %435 }
  0xeb   :  { %v821_v9 = vsel %vm820_vm4, %v819_v4, %v814_v34  ;;  %v919_v13 = vrot.slane %v436_v0, %v1861_v56  ;;  %421 = vadd.xlane.f32.xlu1 %v279_v62  ;;  %v355_v34 = vmul.f32 %v1728_v11, %v137_v23  ;;  %v108_v62 = vld [vmem:[#allocation7 + $0x1e8] sm:$0xff]  ;;  %v356_v23 = vmul.f32 %v1728_v11, %v138_v17 }
  0xec   :  { %v466_v15 = vpop.xlane.xlu1 %465  ;;  %v326_v7 = vmul.f32 %v1703_v39, %v108_v62 }
  0xed   :  { %v920_v16 = vsel %vm820_vm4, %v919_v13, %v915_v41  ;;  %v993_v19 = vrot.slane %v466_v15, %v1840_v18  ;;  %453 = vadd.xlane.f32.xlu0 %v295_v6  ;;  %v1885_v41 = vsub.s32 %v822_v27, %v1672_v3  ;;  %v341_v15 = vmul.f32 %v1714_v54, %v123_v12  ;;  %v110_v12 = vld [vmem:[#allocation7 + $0x1f8] sm:$0xff] }
  0xee   :  { %v496_v21 = vpop.xlane.xlu0 %495  ;;  %v1911_v27 = vsub.s32 %v829_v5, %v1672_v3  ;;  %v328_v5 = vmul.f32 %v1703_v39, %v110_v12 }
  0xef   :  { %v994_v24 = vsel %vm813_vm3, %v993_v19, %v989_v47  ;;  %v1067_v25 = vrot.slane %v496_v21, %v1816_v36  ;;  %483 = vadd.xlane.f32.xlu1 %v310_v14  ;;  %v153_v19 = vld [vmem:[#allocation7 + $0x350] sm:$0xff] }
  0xf0   :  { %v526_v29 = vpop.xlane.xlu1 %525 }
  0xf1   :  { %v1068_v32 = vsel %vm806_vm2, %v1067_v25, %v1063_v53  ;;  %v1141_v33 = vrot.slane %v526_v29, %v1806_v22  ;;  %513 = vadd.xlane.f32.xlu0 %v325_v20  ;;  %v168_v25 = vld [vmem:[#allocation7 + $0x3c8] sm:$0xff]  ;;  %v371_v29 = vmul.f32 %v1739_v31, %v153_v19 }
  0xf2   :  { %v554_v35 = vpop.xlane.xlu0 %553 }
  0xf3   :  { %v1142_v38 = vsel %vm799_vm1, %v1141_v33, %v1137_v2  ;;  %v1211_v40 = vrot.slane %v554_v35, %v1791_v63  ;;  %543 = vadd.xlane.f32.xlu1 %v340_v26  ;;  %v311_v2 = vmul.f32 %v1696_v28, %v93_v55  ;;  %v386_v33 = vmul.f32 %v1753_v52, %v168_v25  ;;  %v109_v35 = vld [vmem:[#allocation7 + $0x1f0] sm:$0xff] }
  0xf4   :  { %v556_v43 = vpop.xlane.xlu1 %555 }
  0xf5   :  { %v1215_v45 = vrot.slane %v556_v43, %v1798_v10  ;;  %573 = vadd.xlane.f32.xlu0 %v355_v34 }
  0xf6   :  { %v406_v47 = vpop.xlane.xlu0 %405 }
  0xf7   :  { %v1216_v49 = vsel %vm792_vm0, %v1215_v45, %v1211_v40  ;;  %v826_v50 = vrot.slane %v406_v47, %v1885_v41  ;;  %603 = vadd.xlane.f32.xlu1 %v370_v42  ;;  %v124_v42 = vld [vmem:[#allocation7 + $0x268] sm:$0xff]  ;;  %v327_v45 = vmul.f32 %v1703_v39, %v109_v35  ;;  %v139_v47 = vld [vmem:[#allocation7 + $0x2e0] sm:$0xff] }
  0xf8   :  { %v438_v53 = vpop.xlane.xlu1 %437 }
  0xf9   :  { %v828_v57 = vsel %vm827_vm5, %v826_v50, %v821_v9  ;;  %v924_v58 = vrot.slane %v438_v53, %v1885_v41  ;;  %633 = vadd.xlane.f32.xlu0 %v385_v46  ;;  %v342_v50 = vmul.f32 %v1714_v54, %v124_v42 }
  0xfa   :  { %v468_v61 = vpop.xlane.xlu0 %467 }
  0xfb   :  { %v925_v8 = vsel %vm827_vm5, %v924_v58, %v920_v16  ;;  %v998_v1 = vrot.slane %v468_v61, %v1861_v56  ;;  %423 = vadd.xlane.f32.xlu1 %v280_v51 }
  0xfc   :  { %v498_v4 = vpop.xlane.xlu1 %497 }
  0xfd   :  { %v999_v6 = vsel %vm820_vm4, %v998_v1, %v994_v24  ;;  %v1072_v0 = vrot.slane %v498_v4, %v1840_v18  ;;  %455 = vadd.xlane.f32.xlu0 %v296_v59  ;;  %v169_v59 = vld [vmem:[#allocation7 + $0x3d0] sm:$0xff] }
  0xfe   :  { %v528_v9 = vpop.xlane.xlu0 %527 }
  0xff   :  { %v1073_v13 = vsel %vm813_vm3, %v1072_v0, %v1068_v32  ;;  %v1146_v14 = vrot.slane %v528_v9, %v1816_v36  ;;  %485 = vadd.xlane.f32.xlu1 %v311_v2  ;;  %v94_v32 = vld [vmem:[#allocation7 + $0x178] sm:$0xff]  ;;  %v836_v9 = vadd.s32 4294967232, %v1786_v60 }
 0x100   :  { %v558_v16 = vpop.xlane.xlu1 %557 }
 0x101   :  { %v1147_v20 = vsel %vm806_vm2, %v1146_v14, %v1142_v38  ;;  %v1220_v21 = vrot.slane %v558_v16, %v1806_v22  ;;  %515 = vadd.xlane.f32.xlu0 %v326_v7  ;;  %v312_v38 = vmul.f32 %v1696_v28, %v94_v32  ;;  %v154_v28 = vld [vmem:[#allocation7 + $0x358] sm:$0xff]  ;;  %v387_v7 = vmul.f32 %v1753_v52, %v169_v59 }
 0x102   :  { %v586_v24 = vpop.xlane.xlu0 %585 }
 0x103   :  { %v1221_v26 = vsel %vm799_vm1, %v1220_v21, %v1216_v49  ;;  %545 = vadd.xlane.f32.xlu1 %v341_v15  ;;  %v1290_v1 = vrot.slane %v586_v24, %v1791_v63  ;;  %v1942_v24 = vsub.s32 %v836_v9, %v1672_v3 }
 0x104   :  { %v588_v30 = vpop.xlane.xlu1 %587 }
 0x105   :  { %575 = vadd.xlane.f32.xlu0 %v356_v23  ;;  %v1294_v2 = vrot.slane %v588_v30, %v1798_v10 }
 0x106   :  { %v408_v34 = vpop.xlane.xlu0 %407 }
 0x107   :  { %v833_v37 = vrot.slane %v408_v34, %v1911_v27  ;;  %605 = vadd.xlane.f32.xlu1 %v371_v29  ;;  %v1295_v16 = vsel %vm792_vm0, %v1294_v2, %v1290_v1  ;;  %v155_v29 = vld [vmem:[#allocation7 + $0x360] sm:$0xff]  ;;  %v142_v1 = vld [vmem:[#allocation7 + $0x2f8] sm:$0xff] }
 0x108   :  { %v440_v40 = vpop.xlane.xlu1 %439  ;;  %v373_v35 = vmul.f32 %v1739_v31, %v155_v29 }
 0x109   :  { %v835_v43 = vsel %vm834_vm6, %v833_v37, %v828_v57  ;;  %v929_v44 = vrot.slane %v440_v40, %v1911_v27  ;;  %635 = vadd.xlane.f32.xlu0 %v386_v33  ;;  %v357_v57 = vmul.f32 %v1728_v11, %v139_v47  ;;  %v170_v33 = vld [vmem:[#allocation7 + $0x3d8] sm:$0xff] }
 0x10a   :  { %v470_v46 = vpop.xlane.xlu0 %469 }
 0x10b   :  { %v930_v48 = vsel %vm834_vm6, %v929_v44, %v925_v8  ;;  %v1003_v49 = vrot.slane %v470_v46, %v1885_v41  ;;  %487 = vadd.xlane.f32.xlu1 %v312_v38  ;;  %v372_v8 = vmul.f32 %v1739_v31, %v154_v28  ;;  %v126_v38 = vld [vmem:[#allocation7 + $0x278] sm:$0xff] }
 0x10c   :  { %v500_v51 = vpop.xlane.xlu1 %499 }
 0x10d   :  { %v1004_v53 = vsel %vm827_vm5, %v1003_v49, %v999_v6  ;;  %v1077_v55 = vrot.slane %v500_v51, %v1861_v56  ;;  %517 = vadd.xlane.f32.xlu0 %v327_v45  ;;  %v141_v45 = vld [vmem:[#allocation7 + $0x2f0] sm:$0xff]  ;;  %v344_v49 = vmul.f32 %v1714_v54, %v126_v38  ;;  %v156_v51 = vld [vmem:[#allocation7 + $0x368] sm:$0xff] }
 0x10e   :  { %v530_v58 = vpop.xlane.xlu0 %529 }
 0x10f   :  { %v1078_v61 = vsel %vm820_vm4, %v1077_v55, %v1073_v13  ;;  %v1151_v62 = vrot.slane %v530_v58, %v1840_v18  ;;  %547 = vadd.xlane.f32.xlu1 %v342_v50  ;;  %v125_v13 = vld [vmem:[#allocation7 + $0x270] sm:$0xff]  ;;  %v359_v55 = vmul.f32 %v1728_v11, %v141_v45  ;;  %v171_v58 = vld [vmem:[#allocation7 + $0x3e0] sm:$0xff] }
 0x110   :  { %v560_v4 = vpop.xlane.xlu1 %559  ;;  %v343_v25 = vmul.f32 %v1714_v54, %v125_v13  ;;  %v843_v54 = vadd.s32 4294967224, %v1786_v60 }
 0x111   :  { %v1152_v6 = vsel %vm813_vm3, %v1151_v62, %v1147_v20  ;;  %v1225_v0 = vrot.slane %v560_v4, %v1816_v36  ;;  %577 = vadd.xlane.f32.xlu0 %v357_v57  ;;  %v140_v20 = vld [vmem:[#allocation7 + $0x2e8] sm:$0xff]  ;;  %v374_v62 = vmul.f32 %v1739_v31, %v156_v51  ;;  %v389_v4 = vmul.f32 %v1753_v52, %v171_v58 }
 0x112   :  { %v590_v17 = vpop.xlane.xlu0 %589  ;;  %v358_v39 = vmul.f32 %v1728_v11, %v140_v20  ;;  %v1969_v9 = vsub.s32 %v843_v54, %v1672_v3 }
 0x113   :  { %v1226_v14 = vsel %vm806_vm2, %v1225_v0, %v1221_v26  ;;  %v1299_v15 = vrot.slane %v590_v17, %v1806_v22  ;;  %607 = vadd.xlane.f32.xlu1 %v372_v8  ;;  %v157_v0 = vld [vmem:[#allocation7 + $0x370] sm:$0xff]  ;;  %v360_v17 = vmul.f32 %v1728_v11, %v142_v1 }
 0x114   :  { %v618_v19 = vpop.xlane.xlu1 %617 }
 0x115   :  { %v1300_v21 = vsel %vm799_vm1, %v1299_v15, %v1295_v16  ;;  %v1369_v23 = vrot.slane %v618_v19, %v1791_v63  ;;  %637 = vadd.xlane.f32.xlu0 %v387_v7  ;;  %v172_v15 = vld [vmem:[#allocation7 + $0x3e8] sm:$0xff]  ;;  %v375_v16 = vmul.f32 %v1739_v31, %v157_v0 }
 0x116   :  { %v620_v26 = vpop.xlane.xlu0 %619 }
 0x117   :  { %v1373_v30 = vrot.slane %v620_v26, %v1798_v10  ;;  %519 = vadd.xlane.f32.xlu1 %v328_v5  ;;  %v388_v10 = vmul.f32 %v1753_v52, %v170_v33  ;;  %v173_v26 = vld [vmem:[#allocation7 + $0x3f0] sm:$0xff] }
 0x118   :  { %v410_v32 = vpop.xlane.xlu1 %409 }
 0x119   :  { %v1374_v34 = vsel %vm792_vm0, %v1373_v30, %v1369_v23  ;;  %v840_v63 = vrot.slane %v410_v32, %v1942_v24  ;;  %549 = vadd.xlane.f32.xlu0 %v343_v25  ;;  %v390_v25 = vmul.f32 %v1753_v52, %v172_v15  ;;  %vm1445_vm0 = vcmask 1041409  }
 0x11a   :  { %v442_v37 = vpop.xlane.xlu0 %441 }
 0x11b   :  { %v842_v40 = vsel %vm841_vm7, %v840_v63, %v835_v43  ;;  %v934_v42 = vrot.slane %v442_v37, %v1942_v24  ;;  %579 = vadd.xlane.f32.xlu1 %v358_v39  ;;  %v174_v39 = vld [vmem:[#allocation7 + $0x3f8] sm:$0xff] }
 0x11c   :  { %v472_v44 = vpop.xlane.xlu1 %471  ;;  %v392_v38 = vmul.f32 %v1753_v52, %v174_v39 }
 0x11d   :  { %v935_v46 = vsel %vm841_vm7, %v934_v42, %v930_v48  ;;  %v1008_v47 = vrot.slane %v472_v44, %v1911_v27  ;;  %609 = vadd.xlane.f32.xlu0 %v373_v35 }
 0x11e   :  { %v502_v50 = vpop.xlane.xlu0 %501 }
 0x11f   :  { %v1009_v28 = vsel %vm834_vm6, %v1008_v47, %v1004_v53  ;;  %v1082_v43 = vrot.slane %v502_v50, %v1885_v41  ;;  %639 = vadd.xlane.f32.xlu1 %v388_v10  ;;  %v850_v10 = vadd.s32 4294967216, %v1786_v60 }
 0x120   :  { %v532_v57 = vpop.xlane.xlu1 %531 }
 0x121   :  { %v1083_v59 = vsel %vm827_vm5, %v1082_v43, %v1078_v61  ;;  %v1156_v48 = vrot.slane %v532_v57, %v1861_v56  ;;  %551 = vadd.xlane.f32.xlu0 %v344_v49 }
 0x122   :  { %v562_v8 = vpop.xlane.xlu0 %561 }
 0x123   :  { %v1157_v53 = vsel %vm820_vm4, %v1156_v48, %v1152_v6  ;;  %v1230_v2 = vrot.slane %v562_v8, %v1840_v18  ;;  %581 = vadd.xlane.f32.xlu1 %v359_v55 }
 0x124   :  { %v592_v12 = vpop.xlane.xlu1 %591 }
 0x125   :  { %v1231_v61 = vsel %vm813_vm3, %v1230_v2, %v1226_v14  ;;  %v1304_v7 = vrot.slane %v592_v12, %v1816_v36  ;;  %611 = vadd.xlane.f32.xlu0 %v374_v62  ;;  %v158_v14 = vld [vmem:[#allocation7 + $0x378] sm:$0xff] }
 0x126   :  { %v622_v13 = vpop.xlane.xlu0 %621 }
 0x127   :  { %v1305_v6 = vsel %vm806_vm2, %v1304_v7, %v1300_v21  ;;  %v1378_v5 = vrot.slane %v622_v13, %v1806_v22  ;;  %641 = vadd.xlane.f32.xlu1 %v389_v4  ;;  %v376_v22 = vmul.f32 %v1739_v31, %v158_v14 }
 0x128   :  { %v412_v19 = vpop.xlane.xlu1 %411 }
 0x129   :  { %v1379_v20 = vsel %vm799_vm1, %v1378_v5, %v1374_v34  ;;  %v847_v23 = vrot.slane %v412_v19, %v1969_v9  ;;  %583 = vadd.xlane.f32.xlu0 %v360_v17  ;;  %v391_v34 = vmul.f32 %v1753_v52, %v173_v26  ;;  %v1995_v52 = vsub.s32 %v850_v10, %v1672_v3 }
 0x12a   :  { %v444_v11 = vpop.xlane.xlu0 %443  ;;  %vm1447_vm1 = vcmask 1042434  }
 0x12b   :  { %v849_v29 = vsel %vm848_vm8, %v847_v23, %v842_v40  ;;  %v939_v21 = vrot.slane %v444_v11, %v1969_v9  ;;  %613 = vadd.xlane.f32.xlu1 %v375_v16  ;;  %v1621_v23 = vmov -inf  }
 0x12c   :  { %v474_v30 = vpop.xlane.xlu1 %473  ;;  %43 = vst.msk [vmem:[#allocation2] sm:$0xff] %vm42_vm10, %v1621_v23 }
 0x12d   :  { %v940_v32 = vsel %vm848_vm8, %v939_v21, %v935_v46  ;;  %v1013_v33 = vrot.slane %v474_v30, %v1942_v24  ;;  %643 = vadd.xlane.f32.xlu0 %v390_v25 }
 0x12e   :  { %v504_v63 = vpop.xlane.xlu0 %503 }
 0x12f   :  { %v1014_v35 = vsel %vm841_vm7, %v1013_v33, %v1009_v28  ;;  %v1087_v37 = vrot.slane %v504_v63, %v1911_v27  ;;  %615 = vadd.xlane.f32.xlu1 %v376_v22 }
 0x130   :  { %v534_v40 = vpop.xlane.xlu1 %533 }
 0x131   :  { %v1088_v31 = vsel %vm834_vm6, %v1087_v37, %v1083_v59  ;;  %v1161_v42 = vrot.slane %v534_v40, %v1885_v41  ;;  %645 = vadd.xlane.f32.xlu0 %v391_v34 }
 0x132   :  { %v564_v44 = vpop.xlane.xlu0 %563 }
 0x133   :  { %v1162_v45 = vsel %vm827_vm5, %v1161_v42, %v1157_v53  ;;  %v1235_v46 = vrot.slane %v564_v44, %v1861_v56  ;;  %647 = vadd.xlane.f32.xlu1 %v392_v38  ;;  %v864_v38 = vadd.s32 4294967200, %v1786_v60 }
 0x134   :  { %v594_v47 = vpop.xlane.xlu1 %593 }
 0x135   :  { %v1236_v49 = vsel %vm820_vm4, %v1235_v46, %v1231_v61  ;;  %v1309_v50 = vrot.slane %v594_v47, %v1840_v18  ;;  %v857_v61 = vadd.s32 4294967208, %v1786_v60  ;;  %v2036_v46 = vsub.s32 %v864_v38, %v1672_v3 }
 0x136   :  { %v624_v51 = vpop.xlane.xlu0 %623 }
 0x137   :  { %v1310_v28 = vsel %vm813_vm3, %v1309_v50, %v1305_v6  ;;  %v1383_v43 = vrot.slane %v624_v51, %v1816_v36  ;;  %v2015_v16 = vsub.s32 %v857_v61, %v1672_v3 }
 0x138   :  { %v414_v55 = vpop.xlane.xlu1 %413 }
 0x139   :  { %v1384_v57 = vsel %vm806_vm2, %v1383_v43, %v1379_v20  ;;  %v854_v58 = vrot.slane %v414_v55, %v1995_v52  ;;  %vm1449_vm2 = vcmask 1043459  }
 0x13a   :  { %v446_v59 = vpop.xlane.xlu0 %445 }
 0x13b   :  { %v856_v48 = vsel %vm855_vm9, %v854_v58, %v849_v29  ;;  %v944_v62 = vrot.slane %v446_v59, %v1995_v52 }
 0x13c   :  { %v476_v54 = vpop.xlane.xlu1 %475 }
 0x13d   :  { %v945_v8 = vsel %vm855_vm9, %v944_v62, %v940_v32  ;;  %v1018_v1 = vrot.slane %v476_v54, %v1969_v9 }
 0x13e   :  { %v506_v53 = vpop.xlane.xlu0 %505 }
 0x13f   :  { %v1019_v2 = vsel %vm848_vm8, %v1018_v1, %v1014_v35  ;;  %v1092_v36 = vrot.slane %v506_v53, %v1942_v24 }
 0x140   :  { %v536_v4 = vpop.xlane.xlu1 %535 }
 0x141   :  { %v1093_v12 = vsel %vm841_vm7, %v1092_v36, %v1088_v31  ;;  %v1166_v0 = vrot.slane %v536_v4, %v1911_v27  ;;  %v871_v36 = vadd.s32 4294967192, %v1786_v60 }
 0x142   :  { %v566_v7 = vpop.xlane.xlu0 %565 }
 0x143   :  { %v1167_v17 = vsel %vm834_vm6, %v1166_v0, %v1162_v45  ;;  %v1240_v13 = vrot.slane %v566_v7, %v1885_v41 }
 0x144   :  { %v596_v15 = vpop.xlane.xlu1 %595 }
 0x145   :  { %v1241_v6 = vsel %vm827_vm5, %v1240_v13, %v1236_v49  ;;  %v1314_v5 = vrot.slane %v596_v15, %v1861_v56  ;;  %v2056_v13 = vsub.s32 %v871_v36, %v1672_v3 }
 0x146   :  { %v626_v19 = vpop.xlane.xlu0 %625 }
 0x147   :  { %v1315_v14 = vsel %vm820_vm4, %v1314_v5, %v1310_v28  ;;  %v1388_v20 = vrot.slane %v626_v19, %v1840_v18 }
 0x148   :  { %v416_v25 = vpop.xlane.xlu1 %415 }
 0x149   :  { %v1389_v11 = vsel %vm813_vm3, %v1388_v20, %v1384_v57  ;;  %v861_v26 = vrot.slane %v416_v25, %v2015_v16  ;;  %vm1451_vm3 = vcmask 1044484  }
 0x14a   :  { %v448_v29 = vpop.xlane.xlu0 %447 }
 0x14b   :  { %v863_v21 = vsel %vm862_vm11, %v861_v26, %v856_v48  ;;  %v949_v22 = vrot.slane %v448_v29, %v2015_v16 }
 0x14c   :  { %v478_v30 = vpop.xlane.xlu1 %477 }
 0x14d   :  { %v950_v39 = vsel %vm862_vm11, %v949_v22, %v945_v8  ;;  %v1023_v32 = vrot.slane %v478_v30, %v1995_v52 }
 0x14e   :  { %v508_v18 = vpop.xlane.xlu0 %507 }
 0x14f   :  { %v1024_v33 = vsel %vm855_vm9, %v1023_v32, %v1019_v2  ;;  %v1097_v34 = vrot.slane %v508_v18, %v1969_v9 }
 0x150   :  { %v538_v63 = vpop.xlane.xlu1 %537 }
 0x151   :  { %v1098_v35 = vsel %vm848_vm8, %v1097_v34, %v1093_v12  ;;  %v1171_v37 = vrot.slane %v538_v63, %v1942_v24 }
 0x152   :  { %v568_v40 = vpop.xlane.xlu0 %567 }
 0x153   :  { %v1172_v31 = vsel %vm841_vm7, %v1171_v37, %v1167_v17  ;;  %v1245_v42 = vrot.slane %v568_v40, %v1911_v27 }
 0x154   :  { %v598_v10 = vpop.xlane.xlu1 %597 }
 0x155   :  { %v1246_v44 = vsel %vm834_vm6, %v1245_v42, %v1241_v6  ;;  %v1319_v45 = vrot.slane %v598_v10, %v1885_v41 }
 0x156   :  { %v628_v47 = vpop.xlane.xlu0 %627 }
 0x157   :  { %v1320_v49 = vsel %vm827_vm5, %v1319_v45, %v1315_v14  ;;  %v1393_v50 = vrot.slane %v628_v47, %v1861_v56 }
 0x158   :  { %v418_v51 = vpop.xlane.xlu1 %417 }
 0x159   :  { %v1394_v28 = vsel %vm820_vm4, %v1393_v50, %v1389_v11  ;;  %v868_v43 = vrot.slane %v418_v51, %v2036_v46  ;;  %vm1453_vm4 = vcmask 1045509  }
 0x15a   :  { %v450_v55 = vpop.xlane.xlu0 %449 }
 0x15b   :  { %v870_v57 = vsel %vm869_vm12, %v868_v43, %v863_v21  ;;  %v954_v58 = vrot.slane %v450_v55, %v2036_v46 }
 0x15c   :  { %v480_v59 = vpop.xlane.xlu1 %479 }
 0x15d   :  { %v955_v48 = vsel %vm869_vm12, %v954_v58, %v950_v39  ;;  %v1028_v62 = vrot.slane %v480_v59, %v2015_v16 }
 0x15e   :  { %v510_v54 = vpop.xlane.xlu0 %509 }
 0x15f   :  { %v1029_v8 = vsel %vm862_vm11, %v1028_v62, %v1024_v33  ;;  %v1102_v56 = vrot.slane %v510_v54, %v1995_v52  ;;  %v878_v33 = vadd.s32 4294967184, %v1786_v60 }
 0x160   :  { %v540_v1 = vpop.xlane.xlu1 %539 }
 0x161   :  { %v1103_v53 = vsel %vm855_vm9, %v1102_v56, %v1098_v35  ;;  %v1176_v2 = vrot.slane %v540_v1, %v1969_v9 }
 0x162   :  { %v570_v4 = vpop.xlane.xlu0 %569 }
 0x163   :  { %v1177_v12 = vsel %vm848_vm8, %v1176_v2, %v1172_v31  ;;  %v1250_v0 = vrot.slane %v570_v4, %v1942_v24  ;;  %v2076_v31 = vsub.s32 %v878_v33, %v1672_v3 }
 0x164   :  { %v600_v61 = vpop.xlane.xlu1 %599 }
 0x165   :  { %v1251_v7 = vsel %vm841_vm7, %v1250_v0, %v1246_v44  ;;  %v1324_v17 = vrot.slane %v600_v61, %v1911_v27 }
 0x166   :  { %v630_v15 = vpop.xlane.xlu0 %629 }
 0x167   :  { %v1325_v6 = vsel %vm834_vm6, %v1324_v17, %v1320_v49  ;;  %v1398_v5 = vrot.slane %v630_v15, %v1885_v41 }
 0x168   :  { %v420_v19 = vpop.xlane.xlu1 %419 }
 0x169   :  { %v1399_v14 = vsel %vm827_vm5, %v1398_v5, %v1394_v28  ;;  %v875_v20 = vrot.slane %v420_v19, %v2056_v13  ;;  %vm1455_vm5 = vcmask 1046534  }
 0x16a   :  { %v452_v23 = vpop.xlane.xlu0 %451 }
 0x16b   :  { %v877_v25 = vsel %vm876_vm13, %v875_v20, %v870_v57  ;;  %v959_v11 = vrot.slane %v452_v23, %v2056_v13 }
 0x16c   :  { %v482_v26 = vpop.xlane.xlu1 %481 }
 0x16d   :  { %v960_v29 = vsel %vm876_vm13, %v959_v11, %v955_v48  ;;  %v1033_v21 = vrot.slane %v482_v26, %v2036_v46 }
 0x16e   :  { %v512_v22 = vpop.xlane.xlu0 %511 }
 0x16f   :  { %v1034_v30 = vsel %vm869_vm12, %v1033_v21, %v1029_v8  ;;  %v1107_v41 = vrot.slane %v512_v22, %v2015_v16  ;;  %v885_v8 = vadd.s32 4294967176, %v1786_v60 }
 0x170   :  { %v542_v39 = vpop.xlane.xlu1 %541 }
 0x171   :  { %v1108_v32 = vsel %vm862_vm11, %v1107_v41, %v1103_v53  ;;  %v1181_v18 = vrot.slane %v542_v39, %v1995_v52 }
 0x172   :  { %v572_v34 = vpop.xlane.xlu0 %571 }
 0x173   :  { %v1182_v63 = vsel %vm855_vm9, %v1181_v18, %v1177_v12  ;;  %v1255_v35 = vrot.slane %v572_v34, %v1969_v9  ;;  %v2096_v12 = vsub.s32 %v885_v8, %v1672_v3 }
 0x174   :  { %v602_v37 = vpop.xlane.xlu1 %601 }
 0x175   :  { %v1256_v38 = vsel %vm848_vm8, %v1255_v35, %v1251_v7  ;;  %v1329_v40 = vrot.slane %v602_v37, %v1942_v24 }
 0x176   :  { %v632_v42 = vpop.xlane.xlu0 %631 }
 0x177   :  { %v1330_v10 = vsel %vm841_vm7, %v1329_v40, %v1325_v6  ;;  %v1403_v44 = vrot.slane %v632_v42, %v1911_v27 }
 0x178   :  { %v422_v45 = vpop.xlane.xlu1 %421 }
 0x179   :  { %v1404_v47 = vsel %vm834_vm6, %v1403_v44, %v1399_v14  ;;  %v882_v49 = vrot.slane %v422_v45, %v2076_v31  ;;  %vm1457_vm6 = vcmask 1047559  }
 0x17a   :  { %v454_v50 = vpop.xlane.xlu0 %453 }
 0x17b   :  { %v884_v51 = vsel %vm883_vm14, %v882_v49, %v877_v25  ;;  %v964_v28 = vrot.slane %v454_v50, %v2076_v31 }
 0x17c   :  { %v484_v43 = vpop.xlane.xlu1 %483 }
 0x17d   :  { %v965_v55 = vsel %vm883_vm14, %v964_v28, %v960_v29  ;;  %v1038_v57 = vrot.slane %v484_v43, %v2056_v13 }
 0x17e   :  { %v514_v58 = vpop.xlane.xlu0 %513 }
 0x17f   :  { %v1039_v59 = vsel %vm876_vm13, %v1038_v57, %v1034_v30  ;;  %v1112_v27 = vrot.slane %v514_v58, %v2036_v46 }
 0x180   :  { %v544_v48 = vpop.xlane.xlu1 %543 }
 0x181   :  { %v1113_v62 = vsel %vm869_vm12, %v1112_v27, %v1108_v32  ;;  %v1186_v54 = vrot.slane %v544_v48, %v2015_v16 }
 0x182   :  { %v574_v56 = vpop.xlane.xlu0 %573 }
 0x183   :  { %v1187_v1 = vsel %vm862_vm11, %v1186_v54, %v1182_v63  ;;  %v1260_v53 = vrot.slane %v574_v56, %v1995_v52 }
 0x184   :  { %v604_v2 = vpop.xlane.xlu1 %603 }
 0x185   :  { %v1261_v36 = vsel %vm855_vm9, %v1260_v53, %v1256_v38  ;;  %v1334_v4 = vrot.slane %v604_v2, %v1969_v9 }
 0x186   :  { %v634_v0 = vpop.xlane.xlu0 %633 }
 0x187   :  { %v1335_v61 = vsel %vm848_vm8, %v1334_v4, %v1330_v10  ;;  %v1408_v7 = vrot.slane %v634_v0, %v1942_v24 }
 0x188   :  { %v424_v17 = vpop.xlane.xlu1 %423 }
 0x189   :  { %v1409_v15 = vsel %vm841_vm7, %v1408_v7, %v1404_v47  ;;  %v889_v6 = vrot.slane %v424_v17, %v2096_v12  ;;  %vm654_vm7 = vcmp.lt.s32.totalorder %v1786_v60, 8 }
 0x18a   :  { %v456_v5 = vpop.xlane.xlu0 %455 }
 0x18b   :  { %v891_v19 = vsel %vm890_vm15, %v889_v6, %v884_v51  ;;  %v969_v14 = vrot.slane %v456_v5, %v2096_v12 }
 0x18c   :  { %v486_v20 = vpop.xlane.xlu1 %485 }
 0x18d   :  { %v970_v3 = vsel %vm890_vm15, %v969_v14, %v965_v55  ;;  %v1043_v23 = vrot.slane %v486_v20, %v2076_v31 }
 0x18e   :  { %v1446_v25 = vsel %vm1445_vm0, %v970_v3, %v891_v19  ;;  %v516_v11 = vpop.xlane.xlu0 %515 }
 0x18f   :  { %v1044_v24 = vsel %vm883_vm14, %v1043_v23, %v1039_v59  ;;  %v1117_v26 = vrot.slane %v516_v11, %v2056_v13 }
 0x190   :  { %v546_v29 = vpop.xlane.xlu1 %545 }
 0x191   :  { %v1118_v21 = vsel %vm876_vm13, %v1117_v26, %v1113_v62  ;;  %v1191_v22 = vrot.slane %v546_v29, %v2036_v46 }
 0x192   :  { %v576_v30 = vpop.xlane.xlu0 %575 }
 0x193   :  { %v1192_v41 = vsel %vm869_vm12, %v1191_v22, %v1187_v1  ;;  %v1265_v39 = vrot.slane %v576_v30, %v2015_v16 }
 0x194   :  { %v606_v32 = vpop.xlane.xlu1 %605 }
 0x195   :  { %v1266_v18 = vsel %vm862_vm11, %v1265_v39, %v1261_v36  ;;  %v1339_v33 = vrot.slane %v606_v32, %v1995_v52 }
 0x196   :  { %v636_v34 = vpop.xlane.xlu0 %635 }
 0x197   :  { %v1340_v63 = vsel %vm855_vm9, %v1339_v33, %v1335_v61  ;;  %v1413_v35 = vrot.slane %v636_v34, %v1969_v9 }
 0x198   :  { %v488_v37 = vpop.xlane.xlu1 %487 }
 0x199   :  { %v1414_v38 = vsel %vm848_vm8, %v1413_v35, %v1409_v15  ;;  %v1048_v40 = vrot.slane %v488_v37, %v2096_v12 }
 0x19a   :  { %v518_v42 = vpop.xlane.xlu0 %517 }
 0x19b   :  { %v1049_v10 = vsel %vm890_vm15, %v1048_v40, %v1044_v24  ;;  %v1122_v44 = vrot.slane %v518_v42, %v2076_v31 }
 0x19c   :  { %v1448_v45 = vsel %vm1447_vm1, %v1049_v10, %v1446_v25  ;;  %v548_v47 = vpop.xlane.xlu1 %547 }
 0x19d   :  { %v1123_v49 = vsel %vm883_vm14, %v1122_v44, %v1118_v21  ;;  %v1196_v50 = vrot.slane %v548_v47, %v2056_v13 }
 0x19e   :  { %v578_v51 = vpop.xlane.xlu0 %577 }
 0x19f   :  { %v1197_v9 = vsel %vm876_vm13, %v1196_v50, %v1192_v41  ;;  %v1270_v28 = vrot.slane %v578_v51, %v2036_v46  ;;  %v1622_v51 = vmov 0  }
 0x1a0   :  { %v608_v43 = vpop.xlane.xlu1 %607  ;;  %1535 = vset.pattern.permute.xlu1 %v1622_v51  ;;  %1536 = vset.pattern.permute.xlu0 %v1622_v51 }
 0x1a1   :  { %v1271_v55 = vsel %vm869_vm12, %v1270_v28, %v1266_v18  ;;  %v1344_v57 = vrot.slane %v608_v43, %v2015_v16 }
 0x1a2   :  { %v638_v58 = vpop.xlane.xlu0 %637 }
 0x1a3   :  { %v1345_v59 = vsel %vm862_vm11, %v1344_v57, %v1340_v63  ;;  %v1418_v27 = vrot.slane %v638_v58, %v1995_v52 }
 0x1a4   :  { %v520_v48 = vpop.xlane.xlu1 %519 }
 0x1a5   :  { %v1419_v62 = vsel %vm855_vm9, %v1418_v27, %v1414_v38  ;;  %v1127_v54 = vrot.slane %v520_v48, %v2096_v12 }
 0x1a6   :  { %v550_v8 = vpop.xlane.xlu0 %549 }
 0x1a7   :  { %v1128_v56 = vsel %vm890_vm15, %v1127_v54, %v1123_v49  ;;  %v1201_v1 = vrot.slane %v550_v8, %v2076_v31 }
 0x1a8   :  { %v1450_v53 = vsel %vm1449_vm2, %v1128_v56, %v1448_v45  ;;  %v580_v2 = vpop.xlane.xlu1 %579 }
 0x1a9   :  { %v1202_v36 = vsel %vm883_vm14, %v1201_v1, %v1197_v9  ;;  %v1275_v4 = vrot.slane %v580_v2, %v2056_v13  ;;  %v1623_v9 = vmov 0.0  }
 0x1aa   :  { %v610_v0 = vpop.xlane.xlu0 %609  ;;  %44 = vst.msk [vmem:[#allocation3] sm:$0xff] %vm42_vm10, %v1623_v9 }
 0x1ab   :  { %v1276_v52 = vsel %vm876_vm13, %v1275_v4, %v1271_v55  ;;  %v1349_v61 = vrot.slane %v610_v0, %v2036_v46 }
 0x1ac   :  { %v640_v7 = vpop.xlane.xlu1 %639 }
 0x1ad   :  { %v1350_v17 = vsel %vm869_vm12, %v1349_v61, %v1345_v59  ;;  %v1423_v15 = vrot.slane %v640_v7, %v2015_v16 }
 0x1ae   :  { %v552_v6 = vpop.xlane.xlu0 %551 }
 0x1af   :  { %v1424_v5 = vsel %vm862_vm11, %v1423_v15, %v1419_v62  ;;  %v1206_v19 = vrot.slane %v552_v6, %v2096_v12 }
 0x1b0   :  { %v582_v14 = vpop.xlane.xlu1 %581 }
 0x1b1   :  { %v1207_v20 = vsel %vm890_vm15, %v1206_v19, %v1202_v36  ;;  %v1280_v3 = vrot.slane %v582_v14, %v2076_v31  ;;  %v1476_v48 = vld [vmem:[#allocation3] sm:$0xff] }
 0x1b2   :  { %v1452_v23 = vsel %vm1451_vm3, %v1207_v20, %v1450_v53  ;;  %v612_v25 = vpop.xlane.xlu0 %611 }
 0x1b3   :  { %v1281_v11 = vsel %vm883_vm14, %v1280_v3, %v1276_v52  ;;  %v1354_v24 = vrot.slane %v612_v25, %v2056_v13 }
 0x1b4   :  { %v642_v26 = vpop.xlane.xlu1 %641 }
 0x1b5   :  { %v1355_v16 = vsel %vm876_vm13, %v1354_v24, %v1350_v17  ;;  %v1428_v29 = vrot.slane %v642_v26, %v2036_v46 }
 0x1b6   :  { %v584_v21 = vpop.xlane.xlu0 %583 }
 0x1b7   :  { %v1429_v22 = vsel %vm869_vm12, %v1428_v29, %v1424_v5  ;;  %v1285_v30 = vrot.slane %v584_v21, %v2096_v12 }
 0x1b8   :  { %v614_v41 = vpop.xlane.xlu1 %613 }
 0x1b9   :  { %v1286_v39 = vsel %vm890_vm15, %v1285_v30, %v1281_v11  ;;  %v1359_v32 = vrot.slane %v614_v41, %v2076_v31 }
 0x1ba   :  { %v644_v18 = vpop.xlane.xlu0 %643  ;;  %v1454_v33 = vsel %vm1453_vm4, %v1286_v39, %v1452_v23 }
 0x1bb   :  { %v1360_v34 = vsel %vm883_vm14, %v1359_v32, %v1355_v16  ;;  %v1433_v63 = vrot.slane %v644_v18, %v2056_v13 }
 0x1bc   :  { %v616_v35 = vpop.xlane.xlu1 %615 }
 0x1bd   :  { %v1434_v46 = vsel %vm876_vm13, %v1433_v63, %v1429_v22  ;;  %v1364_v37 = vrot.slane %v616_v35, %v2096_v12 }
 0x1be   :  { %v646_v38 = vpop.xlane.xlu0 %645 }
 0x1bf   :  { %v1365_v40 = vsel %vm890_vm15, %v1364_v37, %v1360_v34  ;;  %v1438_v42 = vrot.slane %v646_v38, %v2076_v31  ;;  %v1461_v31 = vld [vmem:[#allocation2] sm:$0xff] }
 0x1c0   :  { %v648_v10 = vpop.xlane.xlu1 %647  ;;  %v1456_v44 = vsel %vm1455_vm5, %v1365_v40, %v1454_v33 }
 0x1c1   :  { %v1439_v45 = vsel %vm883_vm14, %v1438_v42, %v1434_v46  ;;  %v1443_v47 = vrot.slane %v648_v10, %v2096_v12 }
 0x1c3   :  { %v1444_v13 = vsel %vm890_vm15, %v1443_v47, %v1439_v45 }
 0x1c4   :  { %v1458_v49 = vsel %vm1457_vm6, %v1444_v13, %v1456_v44 }
 0x1c5   :  { %v1460_v50 = vsel %vm654_vm7, %v1458_v49, -inf }
 0x1c6   :  { %1462 = vmax.xlane.f32.xlu0 %v1460_v50 }
 0x253   :  { %v1463_v28 = vpop.xlane.xlu0 %1462 }
 0x254   :  { %v1464_v43 = vmax.f32 %v1461_v31, %v1463_v28 }
 0x256   :  { %v1465_v55 = vsub.f32 %v1461_v31, %v1464_v43  ;;  %1483 = vst.msk [vmem:[#allocation2] sm:$0xff] %vm42_vm10, %v1464_v43  ;;  %1470 = vperm.xlu1 %1535, %v1464_v43  }
 0x258   :  { %v1466_v59 = vmul.f32 1.442695, %v1465_v55 }
 0x2d5   :  { %v1471_v12 = vpop.permute.xlu1 %1470 }
 0x2d6   :  { %v1473_v60 = vsub.f32 %v1460_v50, %v1471_v12 }
 0x2d8   :  { %v1474_v57 = vmul.f32 1.442695, %v1473_v60 }
 0x2da   :  { %1538 = vpow2.f32 %v1474_v57 }
 0x2db   :  { %1540 = vpow2.f32 %v1466_v59 }
 0x2e4   :  { %v1539_v58 = vpop.eup %1538 }
 0x2e5   :  { %1478 = vadd.xlane.f32.xlu0 %v1539_v58  ;;  %v1541_v27 = vpop.eup %1540 }
 0x2e6   :  { %v1477_v62 = vmul.f32 %v1541_v27, %v1476_v48 }
 0x2fb   :  { %1487 = vperm.xlu0 %1536, %v1541_v27  }
 0x372   :  { %v1479_v54 = vpop.xlane.xlu0 %1478 }
 0x373   :  { %v1480_v8 = vadd.f32 %v1479_v54, %v1477_v62 }
 0x375   :  { %1482 = vst.msk [vmem:[#allocation3] sm:$0xff] %vm42_vm10, %v1480_v8 }
 0x37a   :  { %v1488_v56 = vpop.permute.xlu0 %1487 }
 0x37c   :  { %v1499_v1 = vld [vmem:[#allocation3] sm:$0xff] }
 0x37d   :  { %1542 = vrcp.f32 %v1499_v1 }
 0x387   :  { %v1543_v53 = vpop.eup %1542 }
 0x388   :  { %1504 = vperm.xlu1 %1535, %v1543_v53  }
 0x407   :  { %v1505_v2 = vpop.permute.xlu1 %1504 }
 0x408   :  { %v1507_v36 = vmul.f32 %v1539_v58, %v1505_v2 }
 0x40a   :  { %1508 = vst [vmem:[#allocation9] sm:$0xff] %v1507_v36 }
 0x40b   :  { %1599 = shalt.err (!%p1596_p6)
}
 0x40c   :  { %s1600_s10 = scalar_lea.hbm %s2177_s2, 128 }
 0x40d   :  { %p1601_p7 = scmp.ne.s32.totalorder %s2177_s2, %s1600_s10  ;;  %p1604_p8 = scmp.lt.u32.totalorder %s1600_s10, %s2177_s2 }
 0x40f   :  { %p1606_p9 = pnand %p1604_p8, %p1601_p7 }
 0x411   :  { %1609 = shalt.err (!%p1606_p9)
}
 0x412   :  { %1518 = dma.vmem_to_hbm [thread:$0]  %s1516_s6, 128, %s2177_s2, [#allocation6]  }
 0x413   :  { %1614 = dma.done.wait [#allocation6], 128  }
 0x414   :  { %1615 = vsyncadd [#allocation6], 4294967168 }
 0x415   :  { %1522 = vsyncpa [#allocation5], 1 }
 0x416   :  { %1523 = vsyncpa [#allocation8], 1 }
 0x417   :  { %1524 = vsyncpa [#allocation6], 1 }

</bundles_post_ra>
